<compile_context>
chip_gen: v6e
topology: v6e:2x2x1
jax: 0.10.0
libtpu: 0.0.40
codegen_flags: <defaults>
</compile_context>

<pallas_src>
import jax
import jax.numpy as jnp
from jax.experimental import pallas as pl
from jax.experimental.pallas import tpu as pltpu


def _round_up(x, m):
    return (x + m - 1) // m * m


def _largest_divisor_leq(n, cap):
    for d in range(min(n, cap), 0, -1):
        if n % d == 0:
            return d
    return 1


def lstm_recurrent_kernel(xp_ref, whh_ref, out_ref, h_sc, c_sc):
    """One grid step = TC time steps of the recurrence for one batch tile.

    xp_ref : (TC, TB, 4*Hp)  precomputed x @ W_ih^T + bias, gate-lane-aligned
    whh_ref: (Hp, 4*Hp)      W_hh^T, whole array resident in VMEM
    out_ref: (TC, TB, Hp)    hidden-state outputs for this time chunk
    h_sc, c_sc: (TB, Hp) f32 recurrent state, carried across time chunks
    """

    @pl.when(pl.program_id(1) == 0)          # first time chunk of this batch tile
    def _():
        h_sc[...] = jnp.zeros_like(h_sc)
        c_sc[...] = jnp.zeros_like(c_sc)

    Hp = h_sc.shape[-1]
    TC = xp_ref.shape[0]

    def step(s, carry):
        # (TB, 4*Hp) = precomputed input projection + recurrent projection
        gates = xp_ref[s] + jnp.dot(
            h_sc[...], whh_ref[...], preferred_element_type=jnp.float32
        )
        # Lane-aligned gate slices (each span is a multiple of 128 lanes).
        i_g = jax.nn.sigmoid(gates[:, 0 * Hp:1 * Hp])
        f_g = jax.nn.sigmoid(gates[:, 1 * Hp:2 * Hp])
        g_g = jnp.tanh(gates[:, 2 * Hp:3 * Hp])
        o_g = jax.nn.sigmoid(gates[:, 3 * Hp:4 * Hp])

        c_new = f_g * c_sc[...] + i_g * g_g
        h_new = o_g * jnp.tanh(c_new)

        c_sc[...] = c_new
        h_sc[...] = h_new
        out_ref[s] = h_new.astype(out_ref.dtype)
        return carry

    jax.lax.fori_loop(0, TC, step, 0, unroll=True)


def lstm_forward(x, w_ih, w_hh, b_ih, b_hh, *, time_chunk=16):
    """x: (B, T, I); PyTorch nn.LSTM-shaped params. Returns (B, T, H)."""
    B, T, I = x.shape
    H = w_ih.shape[0] // 4
    Hp = _round_up(H, 128)                    # lane-aligned hidden size
    f32 = jnp.float32

    # ---- Hoisted input projection: one big MXU matmul, bias folded in -----
    bias = (b_ih + b_hh).astype(f32)                                  # (4H,)
    x_proj = jnp.einsum(
        "bti,gi->tbg", x.astype(f32), w_ih.astype(f32),
        preferred_element_type=f32,
    ) + bias                                                          # (T, B, 4H)

    # ---- Lane-align the gate axis: gate g occupies [g*Hp, g*Hp + H) --------
    # Padded hidden units see zero input, zero bias and zero weights, so their
    # (h, c) state provably stays exactly zero and never leaks into real units.
    xp = jnp.zeros((T, B, 4 * Hp), f32)
    whh_t_pad = jnp.zeros((Hp, 4 * Hp), f32)
    whh_t = w_hh.astype(f32).T                                        # (H, 4H)
    for g in range(4):
        xp = xp.at[:, :, g * Hp:g * Hp + H].set(x_proj[:, :, g * H:(g + 1) * H])
        whh_t_pad = whh_t_pad.at[:H, g * Hp:g * Hp + H].set(
            whh_t[:, g * H:(g + 1) * H])

    # ---- Tiling ------------------------------------------------------------
    TC = _largest_divisor_leq(T, time_chunk)  # time steps per grid iteration
    # Two batch tiles when the batch is large enough -> megacore (v7x) can
    # split the "parallel" axis across its TensorCores.
    TB = B // 2 if (B % 16 == 0) else B
    grid = (B // TB, T // TC)

    # VMEM budget (explicit, with headroom) so the tiling is safe on v7x's
    # smaller 64 MiB VMEM as well.
    vmem_est = 4 * (
        2 * TC * TB * 4 * Hp        # x_proj blocks, double-buffered
        + Hp * 4 * Hp               # resident W_hh^T (single copy)
        + 2 * TC * TB * Hp          # output blocks, double-buffered
        + 2 * TB * Hp               # h / c state scratch
    )
    vmem_limit = int(min(100 * 1024 * 1024, max(16 * 1024 * 1024, 4 * vmem_est)))

    out_tm = pl.pallas_call(
        lstm_recurrent_kernel,
        out_shape=jax.ShapeDtypeStruct((T, B, Hp), x.dtype),
        grid_spec=pltpu.PrefetchScalarGridSpec(
            num_scalar_prefetch=0,
            grid=grid,
            in_specs=[
                # Time-chunked, time-major activation slabs.
                pl.BlockSpec((TC, TB, 4 * Hp), lambda b, t: (t, b, 0)),
                # Grid-invariant recurrent weight: whole array resident in
                # VMEM (no per-step DMA, no double buffering).
                pl.BlockSpec(memory_space=pltpu.MemorySpace.VMEM),
            ],
            out_specs=pl.BlockSpec((TC, TB, Hp), lambda b, t: (t, b, 0)),
            scratch_shapes=[
                pltpu.VMEM((TB, Hp), jnp.float32),    # h state
                pltpu.VMEM((TB, Hp), jnp.float32),    # c state
            ],
        ),
        compiler_params=pltpu.CompilerParams(
            dimension_semantics=("parallel", "arbitrary"),
            vmem_limit_bytes=vmem_limit,
        ),
    )(xp, whh_t_pad)

    # Back to PyTorch batch_first layout, dropping hidden padding.
    return jnp.transpose(out_tm, (1, 0, 2))[:, :, :H]


def lstm_reference(x, w_ih, w_hh, b_ih, b_hh):
    """Pure-JAX reference (matches torch.nn.LSTM forward, h0=c0=0)."""
    B, T, I = x.shape
    H = w_ih.shape[0] // 4
    bias = b_ih + b_hh

    def step(carry, x_t):
        h, c = carry
        gates = x_t @ w_ih.T + h @ w_hh.T + bias
        i_g = jax.nn.sigmoid(gates[:, 0 * H:1 * H])
        f_g = jax.nn.sigmoid(gates[:, 1 * H:2 * H])
        g_g = jnp.tanh(gates[:, 2 * H:3 * H])
        o_g = jax.nn.sigmoid(gates[:, 3 * H:4 * H])
        c = f_g * c + i_g * g_g
        h = o_g * jnp.tanh(c)
        return (h, c), h

    h0 = jnp.zeros((B, H), x.dtype)
    c0 = jnp.zeros((B, H), x.dtype)
    (_, _), hs = jax.lax.scan(step, (h0, c0), jnp.transpose(x, (1, 0, 2)))
    return jnp.transpose(hs, (1, 0, 2))


if __name__ == "__main__":
    B, T, INPUT, HIDDEN = 2, 8, 16, 32

    key = jax.random.PRNGKey(0)
    kx, k1, k2, k3, k4 = jax.random.split(key, 5)

    # PyTorch nn.LSTM init: U(-1/sqrt(H), 1/sqrt(H)) for all params.
    bound = 1.0 / jnp.sqrt(jnp.float32(HIDDEN))
    x = jax.random.normal(kx, (B, T, INPUT), dtype=jnp.float32)
    w_ih = jax.random.uniform(k1, (4 * HIDDEN, INPUT), jnp.float32, -bound, bound)
    w_hh = jax.random.uniform(k2, (4 * HIDDEN, HIDDEN), jnp.float32, -bound, bound)
    b_ih = jax.random.uniform(k3, (4 * HIDDEN,), jnp.float32, -bound, bound)
    b_hh = jax.random.uniform(k4, (4 * HIDDEN,), jnp.float32, -bound, bound)

    lstm_fn = jax.jit(lstm_forward)
    out = lstm_fn(x, w_ih, w_hh, b_ih, b_hh)
    out = jax.block_until_ready(out)

    ref = lstm_reference(x, w_ih, w_hh, b_ih, b_hh)
    assert out.shape == (B, T, HIDDEN)
    assert jnp.allclose(out, ref, atol=1e-5, rtol=1e-5), float(
        jnp.max(jnp.abs(out - ref)))

    print("KERNEL_OK")
</pallas_src>

<mosaic_0001>
module attributes {stable_mosaic.version = 11 : i64} {
  func.func @lstm_recurrent_kernel(%arg0: i32, %arg1: i32, %arg2: memref<8x2x512xf32, #tpu.memory_space<vmem>>, %arg3: memref<128x512xf32, #tpu.memory_space<vmem>>, %arg4: memref<8x2x128xf32, #tpu.memory_space<vmem>>, %arg5: memref<2x128xf32, #tpu.memory_space<vmem>>, %arg6: memref<2x128xf32, #tpu.memory_space<vmem>>) attributes {dimension_semantics = [#tpu.dimension_semantics<parallel>, #tpu.dimension_semantics<arbitrary>], iteration_bounds = array<i64: 1, 1>, scalar_prefetch = 0 : i64, scratch_operands = 2 : i64, tpu.core_type = #tpu.core_type<tc>, window_params = [{transform_indices = @transform_0, window_bounds = array<i64: 8, 2, 512>}, {pipeline_mode = #tpu.pipeline_mode<synchronous>, transform_indices = @transform_1, window_bounds = array<i64: 128, 512>}, {transform_indices = @transform_2, window_bounds = array<i64: 8, 2, 128>}]} {
    %c0_i32 = arith.constant 0 : i32
    %0 = arith.cmpi eq, %arg1, %c0_i32 : i32
    %1 = arith.extui %0 : i1 to i32
    %c0_i32_0 = arith.constant 0 : i32
    %2 = arith.cmpi ne, %1, %c0_i32_0 : i32
    scf.if %2 {
      %cst_144 = arith.constant 0.000000e+00 : f32
      %315 = vector.broadcast %cst_144 : f32 to vector<2x128xf32>
      %c0_145 = arith.constant 0 : index
      %c0_146 = arith.constant 0 : index
      %316 = vector.load %arg5[%c0_145, %c0_146] : memref<2x128xf32, #tpu.memory_space<vmem>>, vector<2x128xf32>
      tpu.vector_store %arg5[%c0_145, %c0_146], %315 {strides = array<i32>} : memref<2x128xf32, #tpu.memory_space<vmem>>, vector<2x128xf32>,
      %cst_147 = arith.constant 0.000000e+00 : f32
      %317 = vector.broadcast %cst_147 : f32 to vector<2x128xf32>
      %c0_148 = arith.constant 0 : index
      %c0_149 = arith.constant 0 : index
      %318 = vector.load %arg6[%c0_148, %c0_149] : memref<2x128xf32, #tpu.memory_space<vmem>>, vector<2x128xf32>
      tpu.vector_store %arg6[%c0_148, %c0_149], %317 {strides = array<i32>} : memref<2x128xf32, #tpu.memory_space<vmem>>, vector<2x128xf32>,
    } else {
    }
    %c0_i32_1 = arith.constant 0 : i32
    %3 = arith.index_cast %c0_i32_1 : i32 to index
    %c0 = arith.constant 0 : index
    %c0_2 = arith.constant 0 : index
    %4 = vector.load %arg2[%3, %c0, %c0_2] : memref<8x2x512xf32, #tpu.memory_space<vmem>>, vector<1x2x512xf32>
    %5 = vector.shape_cast %4 : vector<1x2x512xf32> to vector<2x512xf32>
    %c0_3 = arith.constant 0 : index
    %c0_4 = arith.constant 0 : index
    %6 = vector.load %arg5[%c0_3, %c0_4] : memref<2x128xf32, #tpu.memory_space<vmem>>, vector<2x128xf32>
    %c0_5 = arith.constant 0 : index
    %c0_6 = arith.constant 0 : index
    %7 = vector.load %arg3[%c0_5, %c0_6] : memref<128x512xf32, #tpu.memory_space<vmem>>, vector<128x512xf32>
    %cst = arith.constant dense<0.000000e+00> : vector<2x512xf32>
    %8 = tpu.matmul %6, %7, %cst {dimension_numbers = #tpu.dot_dimension_numbers<[1], [0], [0], [1], [0, 0, 1, 1], [], []>} : vector<2x128xf32>, vector<128x512xf32>, vector<2x512xf32> -> vector<2x512xf32>
    %9 = arith.addf %5, %8 : vector<2x512xf32>
    %10 = vector.extract_strided_slice %9 {offsets = [0, 0], sizes = [2, 128], strides = [1, 1]} : vector<2x512xf32> to vector<2x128xf32>
    %11 = arith.negf %10 : vector<2x128xf32>
    %12 = math.exp %11 : vector<2x128xf32>
    %cst_7 = arith.constant 1.000000e+00 : f32
    %13 = vector.broadcast %cst_7 : f32 to vector<2x128xf32>
    %14 = arith.addf %13, %12 : vector<2x128xf32>
    %15 = arith.divf %13, %14 : vector<2x128xf32>
    %16 = vector.extract_strided_slice %9 {offsets = [0, 128], sizes = [2, 128], strides = [1, 1]} : vector<2x512xf32> to vector<2x128xf32>
    %17 = arith.negf %16 : vector<2x128xf32>
    %18 = math.exp %17 : vector<2x128xf32>
    %cst_8 = arith.constant 1.000000e+00 : f32
    %19 = vector.broadcast %cst_8 : f32 to vector<2x128xf32>
    %20 = arith.addf %19, %18 : vector<2x128xf32>
    %21 = arith.divf %19, %20 : vector<2x128xf32>
    %22 = vector.extract_strided_slice %9 {offsets = [0, 256], sizes = [2, 128], strides = [1, 1]} : vector<2x512xf32> to vector<2x128xf32>
    %23 = math.tanh %22 : vector<2x128xf32>
    %24 = vector.extract_strided_slice %9 {offsets = [0, 384], sizes = [2, 128], strides = [1, 1]} : vector<2x512xf32> to vector<2x128xf32>
    %25 = arith.negf %24 : vector<2x128xf32>
    %26 = math.exp %25 : vector<2x128xf32>
    %cst_9 = arith.constant 1.000000e+00 : f32
    %27 = vector.broadcast %cst_9 : f32 to vector<2x128xf32>
    %28 = arith.addf %27, %26 : vector<2x128xf32>
    %29 = arith.divf %27, %28 : vector<2x128xf32>
    %c0_10 = arith.constant 0 : index
    %c0_11 = arith.constant 0 : index
    %30 = vector.load %arg6[%c0_10, %c0_11] : memref<2x128xf32, #tpu.memory_space<vmem>>, vector<2x128xf32>
    %31 = arith.mulf %21, %30 : vector<2x128xf32>
    %32 = arith.mulf %15, %23 : vector<2x128xf32>
    %33 = arith.addf %31, %32 : vector<2x128xf32>
    %34 = math.tanh %33 : vector<2x128xf32>
    %35 = arith.mulf %29, %34 : vector<2x128xf32>
    %c0_12 = arith.constant 0 : index
    %c0_13 = arith.constant 0 : index
    %36 = vector.load %arg6[%c0_12, %c0_13] : memref<2x128xf32, #tpu.memory_space<vmem>>, vector<2x128xf32>
    tpu.vector_store %arg6[%c0_12, %c0_13], %33 {strides = array<i32>} : memref<2x128xf32, #tpu.memory_space<vmem>>, vector<2x128xf32>,
    %c0_14 = arith.constant 0 : index
    %c0_15 = arith.constant 0 : index
    %37 = vector.load %arg5[%c0_14, %c0_15] : memref<2x128xf32, #tpu.memory_space<vmem>>, vector<2x128xf32>
    tpu.vector_store %arg5[%c0_14, %c0_15], %35 {strides = array<i32>} : memref<2x128xf32, #tpu.memory_space<vmem>>, vector<2x128xf32>,
    %38 = arith.index_cast %c0_i32_1 : i32 to index
    %c0_16 = arith.constant 0 : index
    %c0_17 = arith.constant 0 : index
    %39 = vector.load %arg4[%38, %c0_16, %c0_17] : memref<8x2x128xf32, #tpu.memory_space<vmem>>, vector<1x2x128xf32>
    %40 = vector.shape_cast %39 : vector<1x2x128xf32> to vector<2x128xf32>
    %41 = vector.shape_cast %35 : vector<2x128xf32> to vector<1x2x128xf32>
    tpu.vector_store %arg4[%38, %c0_16, %c0_17], %41 {strides = array<i32>} : memref<8x2x128xf32, #tpu.memory_space<vmem>>, vector<1x2x128xf32>,
    %c1_i32 = arith.constant 1 : i32
    %42 = arith.index_cast %c1_i32 : i32 to index
    %c0_18 = arith.constant 0 : index
    %c0_19 = arith.constant 0 : index
    %43 = vector.load %arg2[%42, %c0_18, %c0_19] : memref<8x2x512xf32, #tpu.memory_space<vmem>>, vector<1x2x512xf32>
    %44 = vector.shape_cast %43 : vector<1x2x512xf32> to vector<2x512xf32>
    %c0_20 = arith.constant 0 : index
    %c0_21 = arith.constant 0 : index
    %45 = vector.load %arg5[%c0_20, %c0_21] : memref<2x128xf32, #tpu.memory_space<vmem>>, vector<2x128xf32>
    %c0_22 = arith.constant 0 : index
    %c0_23 = arith.constant 0 : index
    %46 = vector.load %arg3[%c0_22, %c0_23] : memref<128x512xf32, #tpu.memory_space<vmem>>, vector<128x512xf32>
    %cst_24 = arith.constant dense<0.000000e+00> : vector<2x512xf32>
    %47 = tpu.matmul %45, %46, %cst_24 {dimension_numbers = #tpu.dot_dimension_numbers<[1], [0], [0], [1], [0, 0, 1, 1], [], []>} : vector<2x128xf32>, vector<128x512xf32>, vector<2x512xf32> -> vector<2x512xf32>
    %48 = arith.addf %44, %47 : vector<2x512xf32>
    %49 = vector.extract_strided_slice %48 {offsets = [0, 0], sizes = [2, 128], strides = [1, 1]} : vector<2x512xf32> to vector<2x128xf32>
    %50 = arith.negf %49 : vector<2x128xf32>
    %51 = math.exp %50 : vector<2x128xf32>
    %cst_25 = arith.constant 1.000000e+00 : f32
    %52 = vector.broadcast %cst_25 : f32 to vector<2x128xf32>
    %53 = arith.addf %52, %51 : vector<2x128xf32>
    %54 = arith.divf %52, %53 : vector<2x128xf32>
    %55 = vector.extract_strided_slice %48 {offsets = [0, 128], sizes = [2, 128], strides = [1, 1]} : vector<2x512xf32> to vector<2x128xf32>
    %56 = arith.negf %55 : vector<2x128xf32>
    %57 = math.exp %56 : vector<2x128xf32>
    %cst_26 = arith.constant 1.000000e+00 : f32
    %58 = vector.broadcast %cst_26 : f32 to vector<2x128xf32>
    %59 = arith.addf %58, %57 : vector<2x128xf32>
    %60 = arith.divf %58, %59 : vector<2x128xf32>
    %61 = vector.extract_strided_slice %48 {offsets = [0, 256], sizes = [2, 128], strides = [1, 1]} : vector<2x512xf32> to vector<2x128xf32>
    %62 = math.tanh %61 : vector<2x128xf32>
    %63 = vector.extract_strided_slice %48 {offsets = [0, 384], sizes = [2, 128], strides = [1, 1]} : vector<2x512xf32> to vector<2x128xf32>
    %64 = arith.negf %63 : vector<2x128xf32>
    %65 = math.exp %64 : vector<2x128xf32>
    %cst_27 = arith.constant 1.000000e+00 : f32
    %66 = vector.broadcast %cst_27 : f32 to vector<2x128xf32>
    %67 = arith.addf %66, %65 : vector<2x128xf32>
    %68 = arith.divf %66, %67 : vector<2x128xf32>
    %c0_28 = arith.constant 0 : index
    %c0_29 = arith.constant 0 : index
    %69 = vector.load %arg6[%c0_28, %c0_29] : memref<2x128xf32, #tpu.memory_space<vmem>>, vector<2x128xf32>
    %70 = arith.mulf %60, %69 : vector<2x128xf32>
    %71 = arith.mulf %54, %62 : vector<2x128xf32>
    %72 = arith.addf %70, %71 : vector<2x128xf32>
    %73 = math.tanh %72 : vector<2x128xf32>
    %74 = arith.mulf %68, %73 : vector<2x128xf32>
    %c0_30 = arith.constant 0 : index
    %c0_31 = arith.constant 0 : index
    %75 = vector.load %arg6[%c0_30, %c0_31] : memref<2x128xf32, #tpu.memory_space<vmem>>, vector<2x128xf32>
    tpu.vector_store %arg6[%c0_30, %c0_31], %72 {strides = array<i32>} : memref<2x128xf32, #tpu.memory_space<vmem>>, vector<2x128xf32>,
    %c0_32 = arith.constant 0 : index
    %c0_33 = arith.constant 0 : index
    %76 = vector.load %arg5[%c0_32, %c0_33] : memref<2x128xf32, #tpu.memory_space<vmem>>, vector<2x128xf32>
    tpu.vector_store %arg5[%c0_32, %c0_33], %74 {strides = array<i32>} : memref<2x128xf32, #tpu.memory_space<vmem>>, vector<2x128xf32>,
    %77 = arith.index_cast %c1_i32 : i32 to index
    %c0_34 = arith.constant 0 : index
    %c0_35 = arith.constant 0 : index
    %78 = vector.load %arg4[%77, %c0_34, %c0_35] : memref<8x2x128xf32, #tpu.memory_space<vmem>>, vector<1x2x128xf32>
    %79 = vector.shape_cast %78 : vector<1x2x128xf32> to vector<2x128xf32>
    %80 = vector.shape_cast %74 : vector<2x128xf32> to vector<1x2x128xf32>
    tpu.vector_store %arg4[%77, %c0_34, %c0_35], %80 {strides = array<i32>} : memref<8x2x128xf32, #tpu.memory_space<vmem>>, vector<1x2x128xf32>,
    %c2_i32 = arith.constant 2 : i32
    %81 = arith.index_cast %c2_i32 : i32 to index
    %c0_36 = arith.constant 0 : index
    %c0_37 = arith.constant 0 : index
    %82 = vector.load %arg2[%81, %c0_36, %c0_37] : memref<8x2x512xf32, #tpu.memory_space<vmem>>, vector<1x2x512xf32>
    %83 = vector.shape_cast %82 : vector<1x2x512xf32> to vector<2x512xf32>
    %c0_38 = arith.constant 0 : index
    %c0_39 = arith.constant 0 : index
    %84 = vector.load %arg5[%c0_38, %c0_39] : memref<2x128xf32, #tpu.memory_space<vmem>>, vector<2x128xf32>
    %c0_40 = arith.constant 0 : index
    %c0_41 = arith.constant 0 : index
    %85 = vector.load %arg3[%c0_40, %c0_41] : memref<128x512xf32, #tpu.memory_space<vmem>>, vector<128x512xf32>
    %cst_42 = arith.constant dense<0.000000e+00> : vector<2x512xf32>
    %86 = tpu.matmul %84, %85, %cst_42 {dimension_numbers = #tpu.dot_dimension_numbers<[1], [0], [0], [1], [0, 0, 1, 1], [], []>} : vector<2x128xf32>, vector<128x512xf32>, vector<2x512xf32> -> vector<2x512xf32>
    %87 = arith.addf %83, %86 : vector<2x512xf32>
    %88 = vector.extract_strided_slice %87 {offsets = [0, 0], sizes = [2, 128], strides = [1, 1]} : vector<2x512xf32> to vector<2x128xf32>
    %89 = arith.negf %88 : vector<2x128xf32>
    %90 = math.exp %89 : vector<2x128xf32>
    %cst_43 = arith.constant 1.000000e+00 : f32
    %91 = vector.broadcast %cst_43 : f32 to vector<2x128xf32>
    %92 = arith.addf %91, %90 : vector<2x128xf32>
    %93 = arith.divf %91, %92 : vector<2x128xf32>
    %94 = vector.extract_strided_slice %87 {offsets = [0, 128], sizes = [2, 128], strides = [1, 1]} : vector<2x512xf32> to vector<2x128xf32>
    %95 = arith.negf %94 : vector<2x128xf32>
    %96 = math.exp %95 : vector<2x128xf32>
    %cst_44 = arith.constant 1.000000e+00 : f32
    %97 = vector.broadcast %cst_44 : f32 to vector<2x128xf32>
    %98 = arith.addf %97, %96 : vector<2x128xf32>
    %99 = arith.divf %97, %98 : vector<2x128xf32>
    %100 = vector.extract_strided_slice %87 {offsets = [0, 256], sizes = [2, 128], strides = [1, 1]} : vector<2x512xf32> to vector<2x128xf32>
    %101 = math.tanh %100 : vector<2x128xf32>
    %102 = vector.extract_strided_slice %87 {offsets = [0, 384], sizes = [2, 128], strides = [1, 1]} : vector<2x512xf32> to vector<2x128xf32>
    %103 = arith.negf %102 : vector<2x128xf32>
    %104 = math.exp %103 : vector<2x128xf32>
    %cst_45 = arith.constant 1.000000e+00 : f32
    %105 = vector.broadcast %cst_45 : f32 to vector<2x128xf32>
    %106 = arith.addf %105, %104 : vector<2x128xf32>
    %107 = arith.divf %105, %106 : vector<2x128xf32>
    %c0_46 = arith.constant 0 : index
    %c0_47 = arith.constant 0 : index
    %108 = vector.load %arg6[%c0_46, %c0_47] : memref<2x128xf32, #tpu.memory_space<vmem>>, vector<2x128xf32>
    %109 = arith.mulf %99, %108 : vector<2x128xf32>
    %110 = arith.mulf %93, %101 : vector<2x128xf32>
    %111 = arith.addf %109, %110 : vector<2x128xf32>
    %112 = math.tanh %111 : vector<2x128xf32>
    %113 = arith.mulf %107, %112 : vector<2x128xf32>
    %c0_48 = arith.constant 0 : index
    %c0_49 = arith.constant 0 : index
    %114 = vector.load %arg6[%c0_48, %c0_49] : memref<2x128xf32, #tpu.memory_space<vmem>>, vector<2x128xf32>
    tpu.vector_store %arg6[%c0_48, %c0_49], %111 {strides = array<i32>} : memref<2x128xf32, #tpu.memory_space<vmem>>, vector<2x128xf32>,
    %c0_50 = arith.constant 0 : index
    %c0_51 = arith.constant 0 : index
    %115 = vector.load %arg5[%c0_50, %c0_51] : memref<2x128xf32, #tpu.memory_space<vmem>>, vector<2x128xf32>
    tpu.vector_store %arg5[%c0_50, %c0_51], %113 {strides = array<i32>} : memref<2x128xf32, #tpu.memory_space<vmem>>, vector<2x128xf32>,
    %116 = arith.index_cast %c2_i32 : i32 to index
    %c0_52 = arith.constant 0 : index
    %c0_53 = arith.constant 0 : index
    %117 = vector.load %arg4[%116, %c0_52, %c0_53] : memref<8x2x128xf32, #tpu.memory_space<vmem>>, vector<1x2x128xf32>
    %118 = vector.shape_cast %117 : vector<1x2x128xf32> to vector<2x128xf32>
    %119 = vector.shape_cast %113 : vector<2x128xf32> to vector<1x2x128xf32>
    tpu.vector_store %arg4[%116, %c0_52, %c0_53], %119 {strides = array<i32>} : memref<8x2x128xf32, #tpu.memory_space<vmem>>, vector<1x2x128xf32>,
    %c3_i32 = arith.constant 3 : i32
    %120 = arith.index_cast %c3_i32 : i32 to index
    %c0_54 = arith.constant 0 : index
    %c0_55 = arith.constant 0 : index
    %121 = vector.load %arg2[%120, %c0_54, %c0_55] : memref<8x2x512xf32, #tpu.memory_space<vmem>>, vector<1x2x512xf32>
    %122 = vector.shape_cast %121 : vector<1x2x512xf32> to vector<2x512xf32>
    %c0_56 = arith.constant 0 : index
    %c0_57 = arith.constant 0 : index
    %123 = vector.load %arg5[%c0_56, %c0_57] : memref<2x128xf32, #tpu.memory_space<vmem>>, vector<2x128xf32>
    %c0_58 = arith.constant 0 : index
    %c0_59 = arith.constant 0 : index
    %124 = vector.load %arg3[%c0_58, %c0_59] : memref<128x512xf32, #tpu.memory_space<vmem>>, vector<128x512xf32>
    %cst_60 = arith.constant dense<0.000000e+00> : vector<2x512xf32>
    %125 = tpu.matmul %123, %124, %cst_60 {dimension_numbers = #tpu.dot_dimension_numbers<[1], [0], [0], [1], [0, 0, 1, 1], [], []>} : vector<2x128xf32>, vector<128x512xf32>, vector<2x512xf32> -> vector<2x512xf32>
    %126 = arith.addf %122, %125 : vector<2x512xf32>
    %127 = vector.extract_strided_slice %126 {offsets = [0, 0], sizes = [2, 128], strides = [1, 1]} : vector<2x512xf32> to vector<2x128xf32>
    %128 = arith.negf %127 : vector<2x128xf32>
    %129 = math.exp %128 : vector<2x128xf32>
    %cst_61 = arith.constant 1.000000e+00 : f32
    %130 = vector.broadcast %cst_61 : f32 to vector<2x128xf32>
    %131 = arith.addf %130, %129 : vector<2x128xf32>
    %132 = arith.divf %130, %131 : vector<2x128xf32>
    %133 = vector.extract_strided_slice %126 {offsets = [0, 128], sizes = [2, 128], strides = [1, 1]} : vector<2x512xf32> to vector<2x128xf32>
    %134 = arith.negf %133 : vector<2x128xf32>
    %135 = math.exp %134 : vector<2x128xf32>
    %cst_62 = arith.constant 1.000000e+00 : f32
    %136 = vector.broadcast %cst_62 : f32 to vector<2x128xf32>
    %137 = arith.addf %136, %135 : vector<2x128xf32>
    %138 = arith.divf %136, %137 : vector<2x128xf32>
    %139 = vector.extract_strided_slice %126 {offsets = [0, 256], sizes = [2, 128], strides = [1, 1]} : vector<2x512xf32> to vector<2x128xf32>
    %140 = math.tanh %139 : vector<2x128xf32>
    %141 = vector.extract_strided_slice %126 {offsets = [0, 384], sizes = [2, 128], strides = [1, 1]} : vector<2x512xf32> to vector<2x128xf32>
    %142 = arith.negf %141 : vector<2x128xf32>
    %143 = math.exp %142 : vector<2x128xf32>
    %cst_63 = arith.constant 1.000000e+00 : f32
    %144 = vector.broadcast %cst_63 : f32 to vector<2x128xf32>
    %145 = arith.addf %144, %143 : vector<2x128xf32>
    %146 = arith.divf %144, %145 : vector<2x128xf32>
    %c0_64 = arith.constant 0 : index
    %c0_65 = arith.constant 0 : index
    %147 = vector.load %arg6[%c0_64, %c0_65] : memref<2x128xf32, #tpu.memory_space<vmem>>, vector<2x128xf32>
    %148 = arith.mulf %138, %147 : vector<2x128xf32>
    %149 = arith.mulf %132, %140 : vector<2x128xf32>
    %150 = arith.addf %148, %149 : vector<2x128xf32>
    %151 = math.tanh %150 : vector<2x128xf32>
    %152 = arith.mulf %146, %151 : vector<2x128xf32>
    %c0_66 = arith.constant 0 : index
    %c0_67 = arith.constant 0 : index
    %153 = vector.load %arg6[%c0_66, %c0_67] : memref<2x128xf32, #tpu.memory_space<vmem>>, vector<2x128xf32>
    tpu.vector_store %arg6[%c0_66, %c0_67], %150 {strides = array<i32>} : memref<2x128xf32, #tpu.memory_space<vmem>>, vector<2x128xf32>,
    %c0_68 = arith.constant 0 : index
    %c0_69 = arith.constant 0 : index
    %154 = vector.load %arg5[%c0_68, %c0_69] : memref<2x128xf32, #tpu.memory_space<vmem>>, vector<2x128xf32>
    tpu.vector_store %arg5[%c0_68, %c0_69], %152 {strides = array<i32>} : memref<2x128xf32, #tpu.memory_space<vmem>>, vector<2x128xf32>,
    %155 = arith.index_cast %c3_i32 : i32 to index
    %c0_70 = arith.constant 0 : index
    %c0_71 = arith.constant 0 : index
    %156 = vector.load %arg4[%155, %c0_70, %c0_71] : memref<8x2x128xf32, #tpu.memory_space<vmem>>, vector<1x2x128xf32>
    %157 = vector.shape_cast %156 : vector<1x2x128xf32> to vector<2x128xf32>
    %158 = vector.shape_cast %152 : vector<2x128xf32> to vector<1x2x128xf32>
    tpu.vector_store %arg4[%155, %c0_70, %c0_71], %158 {strides = array<i32>} : memref<8x2x128xf32, #tpu.memory_space<vmem>>, vector<1x2x128xf32>,
    %c4_i32 = arith.constant 4 : i32
    %159 = arith.index_cast %c4_i32 : i32 to index
    %c0_72 = arith.constant 0 : index
    %c0_73 = arith.constant 0 : index
    %160 = vector.load %arg2[%159, %c0_72, %c0_73] : memref<8x2x512xf32, #tpu.memory_space<vmem>>, vector<1x2x512xf32>
    %161 = vector.shape_cast %160 : vector<1x2x512xf32> to vector<2x512xf32>
    %c0_74 = arith.constant 0 : index
    %c0_75 = arith.constant 0 : index
    %162 = vector.load %arg5[%c0_74, %c0_75] : memref<2x128xf32, #tpu.memory_space<vmem>>, vector<2x128xf32>
    %c0_76 = arith.constant 0 : index
    %c0_77 = arith.constant 0 : index
    %163 = vector.load %arg3[%c0_76, %c0_77] : memref<128x512xf32, #tpu.memory_space<vmem>>, vector<128x512xf32>
    %cst_78 = arith.constant dense<0.000000e+00> : vector<2x512xf32>
    %164 = tpu.matmul %162, %163, %cst_78 {dimension_numbers = #tpu.dot_dimension_numbers<[1], [0], [0], [1], [0, 0, 1, 1], [], []>} : vector<2x128xf32>, vector<128x512xf32>, vector<2x512xf32> -> vector<2x512xf32>
    %165 = arith.addf %161, %164 : vector<2x512xf32>
    %166 = vector.extract_strided_slice %165 {offsets = [0, 0], sizes = [2, 128], strides = [1, 1]} : vector<2x512xf32> to vector<2x128xf32>
    %167 = arith.negf %166 : vector<2x128xf32>
    %168 = math.exp %167 : vector<2x128xf32>
    %cst_79 = arith.constant 1.000000e+00 : f32
    %169 = vector.broadcast %cst_79 : f32 to vector<2x128xf32>
    %170 = arith.addf %169, %168 : vector<2x128xf32>
    %171 = arith.divf %169, %170 : vector<2x128xf32>
    %172 = vector.extract_strided_slice %165 {offsets = [0, 128], sizes = [2, 128], strides = [1, 1]} : vector<2x512xf32> to vector<2x128xf32>
    %173 = arith.negf %172 : vector<2x128xf32>
    %174 = math.exp %173 : vector<2x128xf32>
    %cst_80 = arith.constant 1.000000e+00 : f32
    %175 = vector.broadcast %cst_80 : f32 to vector<2x128xf32>
    %176 = arith.addf %175, %174 : vector<2x128xf32>
    %177 = arith.divf %175, %176 : vector<2x128xf32>
    %178 = vector.extract_strided_slice %165 {offsets = [0, 256], sizes = [2, 128], strides = [1, 1]} : vector<2x512xf32> to vector<2x128xf32>
    %179 = math.tanh %178 : vector<2x128xf32>
    %180 = vector.extract_strided_slice %165 {offsets = [0, 384], sizes = [2, 128], strides = [1, 1]} : vector<2x512xf32> to vector<2x128xf32>
    %181 = arith.negf %180 : vector<2x128xf32>
    %182 = math.exp %181 : vector<2x128xf32>
    %cst_81 = arith.constant 1.000000e+00 : f32
    %183 = vector.broadcast %cst_81 : f32 to vector<2x128xf32>
    %184 = arith.addf %183, %182 : vector<2x128xf32>
    %185 = arith.divf %183, %184 : vector<2x128xf32>
    %c0_82 = arith.constant 0 : index
    %c0_83 = arith.constant 0 : index
    %186 = vector.load %arg6[%c0_82, %c0_83] : memref<2x128xf32, #tpu.memory_space<vmem>>, vector<2x128xf32>
    %187 = arith.mulf %177, %186 : vector<2x128xf32>
    %188 = arith.mulf %171, %179 : vector<2x128xf32>
    %189 = arith.addf %187, %188 : vector<2x128xf32>
    %190 = math.tanh %189 : vector<2x128xf32>
    %191 = arith.mulf %185, %190 : vector<2x128xf32>
    %c0_84 = arith.constant 0 : index
    %c0_85 = arith.constant 0 : index
    %192 = vector.load %arg6[%c0_84, %c0_85] : memref<2x128xf32, #tpu.memory_space<vmem>>, vector<2x128xf32>
    tpu.vector_store %arg6[%c0_84, %c0_85], %189 {strides = array<i32>} : memref<2x128xf32, #tpu.memory_space<vmem>>, vector<2x128xf32>,
    %c0_86 = arith.constant 0 : index
    %c0_87 = arith.constant 0 : index
    %193 = vector.load %arg5[%c0_86, %c0_87] : memref<2x128xf32, #tpu.memory_space<vmem>>, vector<2x128xf32>
    tpu.vector_store %arg5[%c0_86, %c0_87], %191 {strides = array<i32>} : memref<2x128xf32, #tpu.memory_space<vmem>>, vector<2x128xf32>,
    %194 = arith.index_cast %c4_i32 : i32 to index
    %c0_88 = arith.constant 0 : index
    %c0_89 = arith.constant 0 : index
    %195 = vector.load %arg4[%194, %c0_88, %c0_89] : memref<8x2x128xf32, #tpu.memory_space<vmem>>, vector<1x2x128xf32>
    %196 = vector.shape_cast %195 : vector<1x2x128xf32> to vector<2x128xf32>
    %197 = vector.shape_cast %191 : vector<2x128xf32> to vector<1x2x128xf32>
    tpu.vector_store %arg4[%194, %c0_88, %c0_89], %197 {strides = array<i32>} : memref<8x2x128xf32, #tpu.memory_space<vmem>>, vector<1x2x128xf32>,
    %c5_i32 = arith.constant 5 : i32
    %198 = arith.index_cast %c5_i32 : i32 to index
    %c0_90 = arith.constant 0 : index
    %c0_91 = arith.constant 0 : index
    %199 = vector.load %arg2[%198, %c0_90, %c0_91] : memref<8x2x512xf32, #tpu.memory_space<vmem>>, vector<1x2x512xf32>
    %200 = vector.shape_cast %199 : vector<1x2x512xf32> to vector<2x512xf32>
    %c0_92 = arith.constant 0 : index
    %c0_93 = arith.constant 0 : index
    %201 = vector.load %arg5[%c0_92, %c0_93] : memref<2x128xf32, #tpu.memory_space<vmem>>, vector<2x128xf32>
    %c0_94 = arith.constant 0 : index
    %c0_95 = arith.constant 0 : index
    %202 = vector.load %arg3[%c0_94, %c0_95] : memref<128x512xf32, #tpu.memory_space<vmem>>, vector<128x512xf32>
    %cst_96 = arith.constant dense<0.000000e+00> : vector<2x512xf32>
    %203 = tpu.matmul %201, %202, %cst_96 {dimension_numbers = #tpu.dot_dimension_numbers<[1], [0], [0], [1], [0, 0, 1, 1], [], []>} : vector<2x128xf32>, vector<128x512xf32>, vector<2x512xf32> -> vector<2x512xf32>
    %204 = arith.addf %200, %203 : vector<2x512xf32>
    %205 = vector.extract_strided_slice %204 {offsets = [0, 0], sizes = [2, 128], strides = [1, 1]} : vector<2x512xf32> to vector<2x128xf32>
    %206 = arith.negf %205 : vector<2x128xf32>
    %207 = math.exp %206 : vector<2x128xf32>
    %cst_97 = arith.constant 1.000000e+00 : f32
    %208 = vector.broadcast %cst_97 : f32 to vector<2x128xf32>
    %209 = arith.addf %208, %207 : vector<2x128xf32>
    %210 = arith.divf %208, %209 : vector<2x128xf32>
    %211 = vector.extract_strided_slice %204 {offsets = [0, 128], sizes = [2, 128], strides = [1, 1]} : vector<2x512xf32> to vector<2x128xf32>
    %212 = arith.negf %211 : vector<2x128xf32>
    %213 = math.exp %212 : vector<2x128xf32>
    %cst_98 = arith.constant 1.000000e+00 : f32
    %214 = vector.broadcast %cst_98 : f32 to vector<2x128xf32>
    %215 = arith.addf %214, %213 : vector<2x128xf32>
    %216 = arith.divf %214, %215 : vector<2x128xf32>
    %217 = vector.extract_strided_slice %204 {offsets = [0, 256], sizes = [2, 128], strides = [1, 1]} : vector<2x512xf32> to vector<2x128xf32>
    %218 = math.tanh %217 : vector<2x128xf32>
    %219 = vector.extract_strided_slice %204 {offsets = [0, 384], sizes = [2, 128], strides = [1, 1]} : vector<2x512xf32> to vector<2x128xf32>
    %220 = arith.negf %219 : vector<2x128xf32>
    %221 = math.exp %220 : vector<2x128xf32>
    %cst_99 = arith.constant 1.000000e+00 : f32
    %222 = vector.broadcast %cst_99 : f32 to vector<2x128xf32>
    %223 = arith.addf %222, %221 : vector<2x128xf32>
    %224 = arith.divf %222, %223 : vector<2x128xf32>
    %c0_100 = arith.constant 0 : index
    %c0_101 = arith.constant 0 : index
    %225 = vector.load %arg6[%c0_100, %c0_101] : memref<2x128xf32, #tpu.memory_space<vmem>>, vector<2x128xf32>
    %226 = arith.mulf %216, %225 : vector<2x128xf32>
    %227 = arith.mulf %210, %218 : vector<2x128xf32>
    %228 = arith.addf %226, %227 : vector<2x128xf32>
    %229 = math.tanh %228 : vector<2x128xf32>
    %230 = arith.mulf %224, %229 : vector<2x128xf32>
    %c0_102 = arith.constant 0 : index
    %c0_103 = arith.constant 0 : index
    %231 = vector.load %arg6[%c0_102, %c0_103] : memref<2x128xf32, #tpu.memory_space<vmem>>, vector<2x128xf32>
    tpu.vector_store %arg6[%c0_102, %c0_103], %228 {strides = array<i32>} : memref<2x128xf32, #tpu.memory_space<vmem>>, vector<2x128xf32>,
    %c0_104 = arith.constant 0 : index
    %c0_105 = arith.constant 0 : index
    %232 = vector.load %arg5[%c0_104, %c0_105] : memref<2x128xf32, #tpu.memory_space<vmem>>, vector<2x128xf32>
    tpu.vector_store %arg5[%c0_104, %c0_105], %230 {strides = array<i32>} : memref<2x128xf32, #tpu.memory_space<vmem>>, vector<2x128xf32>,
    %233 = arith.index_cast %c5_i32 : i32 to index
    %c0_106 = arith.constant 0 : index
    %c0_107 = arith.constant 0 : index
    %234 = vector.load %arg4[%233, %c0_106, %c0_107] : memref<8x2x128xf32, #tpu.memory_space<vmem>>, vector<1x2x128xf32>
    %235 = vector.shape_cast %234 : vector<1x2x128xf32> to vector<2x128xf32>
    %236 = vector.shape_cast %230 : vector<2x128xf32> to vector<1x2x128xf32>
    tpu.vector_store %arg4[%233, %c0_106, %c0_107], %236 {strides = array<i32>} : memref<8x2x128xf32, #tpu.memory_space<vmem>>, vector<1x2x128xf32>,
    %c6_i32 = arith.constant 6 : i32
    %237 = arith.index_cast %c6_i32 : i32 to index
    %c0_108 = arith.constant 0 : index
    %c0_109 = arith.constant 0 : index
    %238 = vector.load %arg2[%237, %c0_108, %c0_109] : memref<8x2x512xf32, #tpu.memory_space<vmem>>, vector<1x2x512xf32>
    %239 = vector.shape_cast %238 : vector<1x2x512xf32> to vector<2x512xf32>
    %c0_110 = arith.constant 0 : index
    %c0_111 = arith.constant 0 : index
    %240 = vector.load %arg5[%c0_110, %c0_111] : memref<2x128xf32, #tpu.memory_space<vmem>>, vector<2x128xf32>
    %c0_112 = arith.constant 0 : index
    %c0_113 = arith.constant 0 : index
    %241 = vector.load %arg3[%c0_112, %c0_113] : memref<128x512xf32, #tpu.memory_space<vmem>>, vector<128x512xf32>
    %cst_114 = arith.constant dense<0.000000e+00> : vector<2x512xf32>
    %242 = tpu.matmul %240, %241, %cst_114 {dimension_numbers = #tpu.dot_dimension_numbers<[1], [0], [0], [1], [0, 0, 1, 1], [], []>} : vector<2x128xf32>, vector<128x512xf32>, vector<2x512xf32> -> vector<2x512xf32>
    %243 = arith.addf %239, %242 : vector<2x512xf32>
    %244 = vector.extract_strided_slice %243 {offsets = [0, 0], sizes = [2, 128], strides = [1, 1]} : vector<2x512xf32> to vector<2x128xf32>
    %245 = arith.negf %244 : vector<2x128xf32>
    %246 = math.exp %245 : vector<2x128xf32>
    %cst_115 = arith.constant 1.000000e+00 : f32
    %247 = vector.broadcast %cst_115 : f32 to vector<2x128xf32>
    %248 = arith.addf %247, %246 : vector<2x128xf32>
    %249 = arith.divf %247, %248 : vector<2x128xf32>
    %250 = vector.extract_strided_slice %243 {offsets = [0, 128], sizes = [2, 128], strides = [1, 1]} : vector<2x512xf32> to vector<2x128xf32>
    %251 = arith.negf %250 : vector<2x128xf32>
    %252 = math.exp %251 : vector<2x128xf32>
    %cst_116 = arith.constant 1.000000e+00 : f32
    %253 = vector.broadcast %cst_116 : f32 to vector<2x128xf32>
    %254 = arith.addf %253, %252 : vector<2x128xf32>
    %255 = arith.divf %253, %254 : vector<2x128xf32>
    %256 = vector.extract_strided_slice %243 {offsets = [0, 256], sizes = [2, 128], strides = [1, 1]} : vector<2x512xf32> to vector<2x128xf32>
    %257 = math.tanh %256 : vector<2x128xf32>
    %258 = vector.extract_strided_slice %243 {offsets = [0, 384], sizes = [2, 128], strides = [1, 1]} : vector<2x512xf32> to vector<2x128xf32>
    %259 = arith.negf %258 : vector<2x128xf32>
    %260 = math.exp %259 : vector<2x128xf32>
    %cst_117 = arith.constant 1.000000e+00 : f32
    %261 = vector.broadcast %cst_117 : f32 to vector<2x128xf32>
    %262 = arith.addf %261, %260 : vector<2x128xf32>
    %263 = arith.divf %261, %262 : vector<2x128xf32>
    %c0_118 = arith.constant 0 : index
    %c0_119 = arith.constant 0 : index
    %264 = vector.load %arg6[%c0_118, %c0_119] : memref<2x128xf32, #tpu.memory_space<vmem>>, vector<2x128xf32>
    %265 = arith.mulf %255, %264 : vector<2x128xf32>
    %266 = arith.mulf %249, %257 : vector<2x128xf32>
    %267 = arith.addf %265, %266 : vector<2x128xf32>
    %268 = math.tanh %267 : vector<2x128xf32>
    %269 = arith.mulf %263, %268 : vector<2x128xf32>
    %c0_120 = arith.constant 0 : index
    %c0_121 = arith.constant 0 : index
    %270 = vector.load %arg6[%c0_120, %c0_121] : memref<2x128xf32, #tpu.memory_space<vmem>>, vector<2x128xf32>
    tpu.vector_store %arg6[%c0_120, %c0_121], %267 {strides = array<i32>} : memref<2x128xf32, #tpu.memory_space<vmem>>, vector<2x128xf32>,
    %c0_122 = arith.constant 0 : index
    %c0_123 = arith.constant 0 : index
    %271 = vector.load %arg5[%c0_122, %c0_123] : memref<2x128xf32, #tpu.memory_space<vmem>>, vector<2x128xf32>
    tpu.vector_store %arg5[%c0_122, %c0_123], %269 {strides = array<i32>} : memref<2x128xf32, #tpu.memory_space<vmem>>, vector<2x128xf32>,
    %272 = arith.index_cast %c6_i32 : i32 to index
    %c0_124 = arith.constant 0 : index
    %c0_125 = arith.constant 0 : index
    %273 = vector.load %arg4[%272, %c0_124, %c0_125] : memref<8x2x128xf32, #tpu.memory_space<vmem>>, vector<1x2x128xf32>
    %274 = vector.shape_cast %273 : vector<1x2x128xf32> to vector<2x128xf32>
    %275 = vector.shape_cast %269 : vector<2x128xf32> to vector<1x2x128xf32>
    tpu.vector_store %arg4[%272, %c0_124, %c0_125], %275 {strides = array<i32>} : memref<8x2x128xf32, #tpu.memory_space<vmem>>, vector<1x2x128xf32>,
    %c7_i32 = arith.constant 7 : i32
    %276 = arith.index_cast %c7_i32 : i32 to index
    %c0_126 = arith.constant 0 : index
    %c0_127 = arith.constant 0 : index
    %277 = vector.load %arg2[%276, %c0_126, %c0_127] : memref<8x2x512xf32, #tpu.memory_space<vmem>>, vector<1x2x512xf32>
    %278 = vector.shape_cast %277 : vector<1x2x512xf32> to vector<2x512xf32>
    %c0_128 = arith.constant 0 : index
    %c0_129 = arith.constant 0 : index
    %279 = vector.load %arg5[%c0_128, %c0_129] : memref<2x128xf32, #tpu.memory_space<vmem>>, vector<2x128xf32>
    %c0_130 = arith.constant 0 : index
    %c0_131 = arith.constant 0 : index
    %280 = vector.load %arg3[%c0_130, %c0_131] : memref<128x512xf32, #tpu.memory_space<vmem>>, vector<128x512xf32>
    %cst_132 = arith.constant dense<0.000000e+00> : vector<2x512xf32>
    %281 = tpu.matmul %279, %280, %cst_132 {dimension_numbers = #tpu.dot_dimension_numbers<[1], [0], [0], [1], [0, 0, 1, 1], [], []>} : vector<2x128xf32>, vector<128x512xf32>, vector<2x512xf32> -> vector<2x512xf32>
    %282 = arith.addf %278, %281 : vector<2x512xf32>
    %283 = vector.extract_strided_slice %282 {offsets = [0, 0], sizes = [2, 128], strides = [1, 1]} : vector<2x512xf32> to vector<2x128xf32>
    %284 = arith.negf %283 : vector<2x128xf32>
    %285 = math.exp %284 : vector<2x128xf32>
    %cst_133 = arith.constant 1.000000e+00 : f32
    %286 = vector.broadcast %cst_133 : f32 to vector<2x128xf32>
    %287 = arith.addf %286, %285 : vector<2x128xf32>
    %288 = arith.divf %286, %287 : vector<2x128xf32>
    %289 = vector.extract_strided_slice %282 {offsets = [0, 128], sizes = [2, 128], strides = [1, 1]} : vector<2x512xf32> to vector<2x128xf32>
    %290 = arith.negf %289 : vector<2x128xf32>
    %291 = math.exp %290 : vector<2x128xf32>
    %cst_134 = arith.constant 1.000000e+00 : f32
    %292 = vector.broadcast %cst_134 : f32 to vector<2x128xf32>
    %293 = arith.addf %292, %291 : vector<2x128xf32>
    %294 = arith.divf %292, %293 : vector<2x128xf32>
    %295 = vector.extract_strided_slice %282 {offsets = [0, 256], sizes = [2, 128], strides = [1, 1]} : vector<2x512xf32> to vector<2x128xf32>
    %296 = math.tanh %295 : vector<2x128xf32>
    %297 = vector.extract_strided_slice %282 {offsets = [0, 384], sizes = [2, 128], strides = [1, 1]} : vector<2x512xf32> to vector<2x128xf32>
    %298 = arith.negf %297 : vector<2x128xf32>
    %299 = math.exp %298 : vector<2x128xf32>
    %cst_135 = arith.constant 1.000000e+00 : f32
    %300 = vector.broadcast %cst_135 : f32 to vector<2x128xf32>
    %301 = arith.addf %300, %299 : vector<2x128xf32>
    %302 = arith.divf %300, %301 : vector<2x128xf32>
    %c0_136 = arith.constant 0 : index
    %c0_137 = arith.constant 0 : index
    %303 = vector.load %arg6[%c0_136, %c0_137] : memref<2x128xf32, #tpu.memory_space<vmem>>, vector<2x128xf32>
    %304 = arith.mulf %294, %303 : vector<2x128xf32>
    %305 = arith.mulf %288, %296 : vector<2x128xf32>
    %306 = arith.addf %304, %305 : vector<2x128xf32>
    %307 = math.tanh %306 : vector<2x128xf32>
    %308 = arith.mulf %302, %307 : vector<2x128xf32>
    %c0_138 = arith.constant 0 : index
    %c0_139 = arith.constant 0 : index
    %309 = vector.load %arg6[%c0_138, %c0_139] : memref<2x128xf32, #tpu.memory_space<vmem>>, vector<2x128xf32>
    tpu.vector_store %arg6[%c0_138, %c0_139], %306 {strides = array<i32>} : memref<2x128xf32, #tpu.memory_space<vmem>>, vector<2x128xf32>,
    %c0_140 = arith.constant 0 : index
    %c0_141 = arith.constant 0 : index
    %310 = vector.load %arg5[%c0_140, %c0_141] : memref<2x128xf32, #tpu.memory_space<vmem>>, vector<2x128xf32>
    tpu.vector_store %arg5[%c0_140, %c0_141], %308 {strides = array<i32>} : memref<2x128xf32, #tpu.memory_space<vmem>>, vector<2x128xf32>,
    %311 = arith.index_cast %c7_i32 : i32 to index
    %c0_142 = arith.constant 0 : index
    %c0_143 = arith.constant 0 : index
    %312 = vector.load %arg4[%311, %c0_142, %c0_143] : memref<8x2x128xf32, #tpu.memory_space<vmem>>, vector<1x2x128xf32>
    %313 = vector.shape_cast %312 : vector<1x2x128xf32> to vector<2x128xf32>
    %314 = vector.shape_cast %308 : vector<2x128xf32> to vector<1x2x128xf32>
    tpu.vector_store %arg4[%311, %c0_142, %c0_143], %314 {strides = array<i32>} : memref<8x2x128xf32, #tpu.memory_space<vmem>>, vector<1x2x128xf32>,
    %c8_i32 = arith.constant 8 : i32
    return
  }
  func.func @transform_0(%arg0: i32, %arg1: i32) -> (i32, i32, i32) {
    %c0_i32 = arith.constant 0 : i32
    %c0_i32_0 = arith.constant 0 : i32
    return %arg1, %arg0, %c0_i32 : i32, i32, i32
  }
  func.func @transform_1(%arg0: i32, %arg1: i32) -> (i32, i32) {
    %c0_i32 = arith.constant 0 : i32
    %c0_i32_0 = arith.constant 0 : i32
    %c0_i32_1 = arith.constant 0 : i32
    return %c0_i32, %c0_i32_0 : i32, i32
  }
  func.func @transform_2(%arg0: i32, %arg1: i32) -> (i32, i32, i32) {
    %c0_i32 = arith.constant 0 : i32
    %c0_i32_0 = arith.constant 0 : i32
    return %arg1, %arg0, %c0_i32 : i32, i32, i32
  }
}

</mosaic_0001>

<bundles_post_ra>
// kernel: lstm_forward.1
= control target key start
LH: loop header
LB: loop body
LE: loop exit
PB: predicated region body
PF: predicated region fallthrough
CT: control target
= control target key end

     0   :  { %v3715_v3 = vmov 0.0   ;;  %s3712_s1 = inlined_call_operand.vmem [shape: f32[128,512], index: 1, kind: input, shape index: {}]   ;;  %s3713_s0 = inlined_call_operand.vmem [shape: f32[8,2,512], index: 0, kind: input, shape index: {}]   ;;  %s3714_s2 = inlined_call_operand.vmem [shape: f32[8,2,128], index: 2, kind: output, shape index: {}]  }
   0x1   :  { %v2351_v0 = vld [vmem:[%s3712_s1 + $0x1e8] sm:$0xff]  ;;  %v2356_v1 = vld [vmem:[%s3712_s1 + $0x1f8] sm:$0xff]  ;;  %v2361_v2 = vld [vmem:[%s3712_s1 + $0x1e0] sm:$0xff]  ;;  %147 = vmatprep.mubr.f32.mxu0 %v3715_v3  ;;  %15 = vst [vmem:[#allocation2] sm:$0x3] %v3715_v3  ;;  %218 = vmatprep.mubr.f32.mxu1 %v3715_v3 }
   0x2   :  { %16 = vst [vmem:[#allocation3] sm:$0x3] %v3715_v3  ;;  %83 = vmatprep.subr.mxu0 %v2351_v0  ;;  %154 = vmatprep.subr.mxu1 %v2356_v1  ;;  %v2372_v4 = vld [vmem:[%s3712_s1 + $0x1f0] sm:$0xff]  ;;  %v2377_v5 = vld [vmem:[%s3712_s1 + $0x1c8] sm:$0xff]  ;;  %v2382_v6 = vld [vmem:[%s3712_s1 + $0x1d8] sm:$0xff] }
   0x3   :  { %84 = vmatpush1.msra.mxu0 %v2361_v2  ;;  %155 = vmatpush1.msra.mxu1 %v2372_v4  ;;  %v2389_v7 = vld [vmem:[%s3712_s1 + $0x1c0] sm:$0xff]  ;;  %v2394_v8 = vld [vmem:[%s3712_s1 + $0x1d0] sm:$0xff]  ;;  %v2399_v9 = vld [vmem:[%s3712_s1 + $0x1a8] sm:$0xff] }
   0x4   :  { %85 = vmatprep.subr.mxu0 %v2377_v5  ;;  %156 = vmatprep.subr.mxu1 %v2382_v6  ;;  %v2406_v10 = vld [vmem:[%s3712_s1 + $0x1b8] sm:$0xff]  ;;  %v2411_v11 = vld [vmem:[%s3712_s1 + $0x1a0] sm:$0xff]  ;;  %v2416_v12 = vld [vmem:[%s3712_s1 + $0x1b0] sm:$0xff] }
   0x5   :  { %86 = vmatpush1.msra.mxu0 %v2389_v7  ;;  %157 = vmatpush1.msra.mxu1 %v2394_v8  ;;  %v2423_v13 = vld [vmem:[%s3712_s1 + $0x188] sm:$0xff]  ;;  %v2428_v14 = vld [vmem:[%s3712_s1 + $0x198] sm:$0xff]  ;;  %v2435_v15 = vld [vmem:[%s3712_s1 + $0x180] sm:$0xff] }
   0x6   :  { %87 = vmatprep.subr.mxu0 %v2399_v9  ;;  %158 = vmatprep.subr.mxu1 %v2406_v10  ;;  %v2440_v16 = vld [vmem:[%s3712_s1 + $0x190] sm:$0xff]  ;;  %v2447_v17 = vld [vmem:[%s3712_s1 + $0x168] sm:$0xff]  ;;  %v2452_v18 = vld [vmem:[%s3712_s1 + $0x178] sm:$0xff] }
   0x7   :  { %88 = vmatpush1.msra.mxu0 %v2411_v11  ;;  %159 = vmatpush1.msra.mxu1 %v2416_v12  ;;  %v2459_v19 = vld [vmem:[%s3712_s1 + $0x160] sm:$0xff]  ;;  %v2464_v20 = vld [vmem:[%s3712_s1 + $0x170] sm:$0xff]  ;;  %v2471_v21 = vld [vmem:[%s3712_s1 + $0x148] sm:$0xff] }
   0x8   :  { %89 = vmatprep.subr.mxu0 %v2423_v13  ;;  %160 = vmatprep.subr.mxu1 %v2428_v14  ;;  %v2476_v22 = vld [vmem:[%s3712_s1 + $0x158] sm:$0xff]  ;;  %v2483_v23 = vld [vmem:[%s3712_s1 + $0x140] sm:$0xff]  ;;  %v2488_v24 = vld [vmem:[%s3712_s1 + $0x150] sm:$0xff] }
   0x9   :  { %90 = vmatpush1.msra.mxu0 %v2435_v15  ;;  %161 = vmatpush1.msra.mxu1 %v2440_v16  ;;  %v2495_v25 = vld [vmem:[%s3712_s1 + $0x128] sm:$0xff]  ;;  %v2500_v26 = vld [vmem:[%s3712_s1 + $0x138] sm:$0xff]  ;;  %v2507_v27 = vld [vmem:[%s3712_s1 + $0x120] sm:$0xff] }
   0xa   :  { %91 = vmatprep.subr.mxu0 %v2447_v17  ;;  %162 = vmatprep.subr.mxu1 %v2452_v18  ;;  %v2512_v28 = vld [vmem:[%s3712_s1 + $0x130] sm:$0xff]  ;;  %v2519_v29 = vld [vmem:[%s3712_s1 + $0x108] sm:$0xff]  ;;  %v2524_v30 = vld [vmem:[%s3712_s1 + $0x118] sm:$0xff] }
   0xb   :  { %92 = vmatpush1.msra.mxu0 %v2459_v19  ;;  %163 = vmatpush1.msra.mxu1 %v2464_v20  ;;  %v2531_v31 = vld [vmem:[%s3712_s1 + $0x100] sm:$0xff]  ;;  %v2536_v32 = vld [vmem:[%s3712_s1 + $0x110] sm:$0xff]  ;;  %v2543_v33 = vld [vmem:[%s3712_s1 + $0xe8] sm:$0xff] }
   0xc   :  { %93 = vmatprep.subr.mxu0 %v2471_v21  ;;  %164 = vmatprep.subr.mxu1 %v2476_v22  ;;  %v2548_v34 = vld [vmem:[%s3712_s1 + $0xf8] sm:$0xff]  ;;  %v2555_v35 = vld [vmem:[%s3712_s1 + $0xe0] sm:$0xff]  ;;  %v2560_v36 = vld [vmem:[%s3712_s1 + $0xf0] sm:$0xff] }
   0xd   :  { %94 = vmatpush1.msra.mxu0 %v2483_v23  ;;  %165 = vmatpush1.msra.mxu1 %v2488_v24  ;;  %v2567_v37 = vld [vmem:[%s3712_s1 + $0xc8] sm:$0xff]  ;;  %v2572_v38 = vld [vmem:[%s3712_s1 + $0xd8] sm:$0xff]  ;;  %v2579_v39 = vld [vmem:[%s3712_s1 + $0xc0] sm:$0xff] }
   0xe   :  { %95 = vmatprep.subr.mxu0 %v2495_v25  ;;  %166 = vmatprep.subr.mxu1 %v2500_v26  ;;  %v2584_v40 = vld [vmem:[%s3712_s1 + $0xd0] sm:$0xff]  ;;  %v2591_v41 = vld [vmem:[%s3712_s1 + $0xa8] sm:$0xff]  ;;  %v2596_v42 = vld [vmem:[%s3712_s1 + $0xb8] sm:$0xff] }
   0xf   :  { %96 = vmatpush1.msra.mxu0 %v2507_v27  ;;  %167 = vmatpush1.msra.mxu1 %v2512_v28  ;;  %v2603_v43 = vld [vmem:[%s3712_s1 + $0xa0] sm:$0xff]  ;;  %v2608_v44 = vld [vmem:[%s3712_s1 + $0xb0] sm:$0xff]  ;;  %v2615_v45 = vld [vmem:[%s3712_s1 + $0x88] sm:$0xff] }
  0x10   :  { %97 = vmatprep.subr.mxu0 %v2519_v29  ;;  %168 = vmatprep.subr.mxu1 %v2524_v30  ;;  %v2620_v46 = vld [vmem:[%s3712_s1 + $0x98] sm:$0xff]  ;;  %v2627_v47 = vld [vmem:[%s3712_s1 + $0x80] sm:$0xff]  ;;  %v2632_v48 = vld [vmem:[%s3712_s1 + $0x90] sm:$0xff] }
  0x11   :  { %98 = vmatpush1.msra.mxu0 %v2531_v31  ;;  %169 = vmatpush1.msra.mxu1 %v2536_v32  ;;  %v2639_v49 = vld [vmem:[%s3712_s1 + $0x68] sm:$0xff]  ;;  %v2644_v50 = vld [vmem:[%s3712_s1 + $0x78] sm:$0xff]  ;;  %v2651_v51 = vld [vmem:[%s3712_s1 + $0x60] sm:$0xff] }
  0x12   :  { %99 = vmatprep.subr.mxu0 %v2543_v33  ;;  %170 = vmatprep.subr.mxu1 %v2548_v34  ;;  %3774 = vst [vmem:[#allocation4_spill] sm:$0xff] %v2639_v49  ;;  %3775 = vst [vmem:[#allocation5_spill] sm:$0xff] %v2644_v50  ;;  %v2656_v52 = vld [vmem:[%s3712_s1 + $0x70] sm:$0xff]  ;;  %v2663_v53 = vld [vmem:[%s3712_s1 + $0x48] sm:$0xff] }
  0x13   :  { %100 = vmatpush1.msra.mxu0 %v2555_v35  ;;  %171 = vmatpush1.msra.mxu1 %v2560_v36  ;;  %3776 = vst [vmem:[#allocation6_spill] sm:$0xff] %v2651_v51  ;;  %3777 = vst [vmem:[#allocation7_spill] sm:$0xff] %v2656_v52  ;;  %v2668_v54 = vld [vmem:[%s3712_s1 + $0x58] sm:$0xff]  ;;  %v2675_v55 = vld [vmem:[%s3712_s1 + $0x40] sm:$0xff] }
  0x14   :  { %101 = vmatprep.subr.mxu0 %v2567_v37  ;;  %172 = vmatprep.subr.mxu1 %v2572_v38  ;;  %3778 = vst [vmem:[#allocation8_spill] sm:$0xff] %v2663_v53  ;;  %3779 = vst [vmem:[#allocation9_spill] sm:$0xff] %v2668_v54  ;;  %v2680_v56 = vld [vmem:[%s3712_s1 + $0x50] sm:$0xff]  ;;  %v2687_v57 = vld [vmem:[%s3712_s1 + $0x28] sm:$0xff] }
  0x15   :  { %102 = vmatpush1.msra.mxu0 %v2579_v39  ;;  %173 = vmatpush1.msra.mxu1 %v2584_v40  ;;  %3780 = vst [vmem:[#allocation10_spill] sm:$0xff] %v2675_v55  ;;  %3781 = vst [vmem:[#allocation11_spill] sm:$0xff] %v2680_v56  ;;  %v2692_v58 = vld [vmem:[%s3712_s1 + $0x38] sm:$0xff]  ;;  %v2699_v59 = vld [vmem:[%s3712_s1 + $0x20] sm:$0xff] }
  0x16   :  { %103 = vmatprep.subr.mxu0 %v2591_v41  ;;  %174 = vmatprep.subr.mxu1 %v2596_v42  ;;  %3782 = vst [vmem:[#allocation12_spill] sm:$0xff] %v2687_v57  ;;  %3783 = vst [vmem:[#allocation13_spill] sm:$0xff] %v2692_v58  ;;  %v2704_v60 = vld [vmem:[%s3712_s1 + $0x30] sm:$0xff]  ;;  %v2711_v61 = vld [vmem:[%s3712_s1 + $0x8] sm:$0xff] }
  0x17   :  { %104 = vmatpush1.msra.mxu0 %v2603_v43  ;;  %175 = vmatpush1.msra.mxu1 %v2608_v44  ;;  %3784 = vst [vmem:[#allocation14_spill] sm:$0xff] %v2699_v59  ;;  %3785 = vst [vmem:[#allocation15_spill] sm:$0xff] %v2704_v60  ;;  %v2716_v62 = vld [vmem:[%s3712_s1 + $0x18] sm:$0xff]  ;;  %v2723_v63 = vld [vmem:[%s3712_s1] sm:$0xff] }
  0x18   :  { %105 = vmatprep.subr.mxu0 %v2615_v45  ;;  %176 = vmatprep.subr.mxu1 %v2620_v46  ;;  %3786 = vst [vmem:[#allocation16_spill] sm:$0xff] %v2711_v61  ;;  %3787 = vst [vmem:[#allocation17_spill] sm:$0xff] %v2716_v62  ;;  %v2728_v3 = vld [vmem:[%s3712_s1 + $0x10] sm:$0xff] }
  0x19   :  { %106 = vmatpush1.msra.mxu0 %v2627_v47  ;;  %177 = vmatpush1.msra.mxu1 %v2632_v48  ;;  %3788 = vst [vmem:[#allocation18_spill] sm:$0xff] %v2723_v63  ;;  %3789 = vst [vmem:[#allocation19_spill] sm:$0xff] %v2728_v3 }
  0x1a   :  { %107 = vmatprep.subr.mxu0 %v2639_v49  ;;  %178 = vmatprep.subr.mxu1 %v2644_v50 }
  0x1b   :  { %108 = vmatpush1.msra.mxu0 %v2651_v51  ;;  %179 = vmatpush1.msra.mxu1 %v2656_v52 }
  0x1c   :  { %109 = vmatprep.subr.mxu0 %v2663_v53  ;;  %180 = vmatprep.subr.mxu1 %v2668_v54 }
  0x1d   :  { %110 = vmatpush1.msra.mxu0 %v2675_v55  ;;  %181 = vmatpush1.msra.mxu1 %v2680_v56  ;;  %v18_v56 = vld [vmem:[#allocation2] sm:$0x3] }
  0x1e   :  { %111 = vmatprep.subr.mxu0 %v2687_v57  ;;  %182 = vmatprep.subr.mxu1 %v2692_v58 }
  0x1f   :  { %112 = vmatpush1.msra.mxu0 %v2699_v59  ;;  %183 = vmatpush1.msra.mxu1 %v2704_v60 }
  0x20   :  { %113 = vmatprep.subr.mxu0 %v2711_v61  ;;  %184 = vmatprep.subr.mxu1 %v2716_v62 }
  0x21   :  { %114 = vmatpush1.msra.mxu0 %v2723_v63  ;;  %185 = vmatpush1.msra.mxu1 %v2728_v3 }
  0x22   :  { %148 = vmatmul.mubr.f32.vlgmr.msra.gmra.mxu0 %v18_v56  ;;  %219 = vmatmul.mubr.f32.vlgmr.msra.gmra.mxu1 %v18_v56  ;;  %v3790_v56 = vld [vmem:[#allocation11_spill] sm:$0xff] }
  0x23   :  { %350 = vmatprep.subr.mxu0 %v2351_v0  ;;  %421 = vmatprep.subr.mxu1 %v2356_v1 }
  0x24   :  { %351 = vmatpush1.msra.mxu0 %v2361_v2  ;;  %422 = vmatpush1.msra.mxu1 %v2372_v4 }
  0x25   :  { %352 = vmatprep.subr.mxu0 %v2377_v5  ;;  %423 = vmatprep.subr.mxu1 %v2382_v6 }
  0x26   :  { %353 = vmatpush1.msra.mxu0 %v2389_v7  ;;  %424 = vmatpush1.msra.mxu1 %v2394_v8 }
  0x27   :  { %354 = vmatprep.subr.mxu0 %v2399_v9  ;;  %425 = vmatprep.subr.mxu1 %v2406_v10 }
  0x28   :  { %355 = vmatpush1.msra.mxu0 %v2411_v11  ;;  %426 = vmatpush1.msra.mxu1 %v2416_v12 }
  0x29   :  { %356 = vmatprep.subr.mxu0 %v2423_v13  ;;  %427 = vmatprep.subr.mxu1 %v2428_v14 }
  0x2a   :  { %357 = vmatpush1.msra.mxu0 %v2435_v15  ;;  %428 = vmatpush1.msra.mxu1 %v2440_v16 }
  0x2b   :  { %358 = vmatprep.subr.mxu0 %v2447_v17  ;;  %429 = vmatprep.subr.mxu1 %v2452_v18 }
  0x2c   :  { %359 = vmatpush1.msra.mxu0 %v2459_v19  ;;  %430 = vmatpush1.msra.mxu1 %v2464_v20 }
  0x2d   :  { %360 = vmatprep.subr.mxu0 %v2471_v21  ;;  %431 = vmatprep.subr.mxu1 %v2476_v22 }
  0x2e   :  { %361 = vmatpush1.msra.mxu0 %v2483_v23  ;;  %432 = vmatpush1.msra.mxu1 %v2488_v24 }
  0x2f   :  { %362 = vmatprep.subr.mxu0 %v2495_v25  ;;  %433 = vmatprep.subr.mxu1 %v2500_v26 }
  0x30   :  { %363 = vmatpush1.msra.mxu0 %v2507_v27  ;;  %434 = vmatpush1.msra.mxu1 %v2512_v28 }
  0x31   :  { %364 = vmatprep.subr.mxu0 %v2519_v29  ;;  %435 = vmatprep.subr.mxu1 %v2524_v30 }
  0x32   :  { %365 = vmatpush1.msra.mxu0 %v2531_v31  ;;  %436 = vmatpush1.msra.mxu1 %v2536_v32 }
  0x33   :  { %366 = vmatprep.subr.mxu0 %v2543_v33  ;;  %437 = vmatprep.subr.mxu1 %v2548_v34 }
  0x34   :  { %367 = vmatpush1.msra.mxu0 %v2555_v35  ;;  %438 = vmatpush1.msra.mxu1 %v2560_v36 }
  0x35   :  { %368 = vmatprep.subr.mxu0 %v2567_v37  ;;  %439 = vmatprep.subr.mxu1 %v2572_v38 }
  0x36   :  { %369 = vmatpush1.msra.mxu0 %v2579_v39  ;;  %440 = vmatpush1.msra.mxu1 %v2584_v40 }
  0x37   :  { %370 = vmatprep.subr.mxu0 %v2591_v41  ;;  %441 = vmatprep.subr.mxu1 %v2596_v42 }
  0x38   :  { %371 = vmatpush1.msra.mxu0 %v2603_v43  ;;  %442 = vmatpush1.msra.mxu1 %v2608_v44 }
  0x39   :  { %372 = vmatprep.subr.mxu0 %v2615_v45  ;;  %443 = vmatprep.subr.mxu1 %v2620_v46 }
  0x3a   :  { %373 = vmatpush1.msra.mxu0 %v2627_v47  ;;  %444 = vmatpush1.msra.mxu1 %v2632_v48 }
  0x3b   :  { %374 = vmatprep.subr.mxu0 %v2639_v49  ;;  %445 = vmatprep.subr.mxu1 %v2644_v50 }
  0x3c   :  { %375 = vmatpush1.msra.mxu0 %v2651_v51  ;;  %446 = vmatpush1.msra.mxu1 %v2656_v52 }
  0x3d   :  { %376 = vmatprep.subr.mxu0 %v2663_v53  ;;  %447 = vmatprep.subr.mxu1 %v2668_v54  ;;  %v3791_v53 = vmov 0.0  }
  0x3e   :  { %377 = vmatpush1.msra.mxu0 %v2675_v55  ;;  %448 = vmatpush1.msra.mxu1 %v3790_v56 }
  0x3f   :  { %378 = vmatprep.subr.mxu0 %v2687_v57  ;;  %449 = vmatprep.subr.mxu1 %v2692_v58  ;;  %v2332_v58 = vmov 1983009808   ;;  %v234_v57 = vlaneseq }
  0x40   :  { %379 = vmatpush1.msra.mxu0 %v2699_v59  ;;  %450 = vmatpush1.msra.mxu1 %v2704_v60  ;;  %v232_v59 = vunpack.c.l.s4 %v2332_v58 }
  0x41   :  { %380 = vmatprep.subr.mxu0 %v2711_v61  ;;  %451 = vmatprep.subr.mxu1 %v2716_v62  ;;  %v235_v56 = vshrl.u32 %v234_v57, 7 }
  0x42   :  { %381 = vmatpush1.msra.mxu0 %v2723_v63  ;;  %414 = vmatprep.mubr.f32.mxu0 %v3791_v53  ;;  %v233_v60 = vunpack.c.0.s8 %v232_v59 }
  0x43   :  { %452 = vmatpush1.msra.mxu1 %v2728_v3  ;;  %485 = vmatprep.mubr.f32.mxu1 %v3791_v53 }
  0x44   :  { %618 = vmatprep.subr.mxu0 %v2351_v0  ;;  %689 = vmatprep.subr.mxu1 %v2356_v1  ;;  %v2804_v62 = vsub.s32 %v233_v60, %v235_v56  ;;  %v17_v0 = vld [vmem:[%s3713_s0] sm:$0xff] }
  0xe2   :  { %v149_v61 = vpop.f32.mrf.mxu0  ;;  %v220_v55 = vpop.f32.mrf.mxu1 }
  0xe4   :  { %v151_v63 = vpop.f32.mrf.mxu0  ;;  %v222_v54 = vpop.f32.mrf.mxu1 }
  0xe5   :  { %v229_v52 = vcombine.low %v149_v61, %v151_v63  ;;  %v230_v51 = vcombine.low %v220_v55, %v222_v54 }
  0xe7   :  { %v237_v3 = vrot.slane %v229_v52, %v2804_v62  ;;  %v244_v53 = vrot.slane %v230_v51, %v2804_v62 }
  0xe9   :  { %v245_v1 = vcombine.low %v237_v3, %v244_v53  ;;  %v274_v3 = vld [vmem:[#allocation3] sm:$0x3] }
  0xeb   :  { %v247_v58 = vadd.f32 %v245_v1, %v17_v0 }
  0xed   :  { %v2163_v59 = vmul.f32 -1.442695, %v247_v58  ;;  %v255_v57 = vrot.slane %v247_v58, 2  ;;  %v266_v60 = vrot.slane %v247_v58, 6  ;;  %v263_v61 = vrot.slane %v247_v58, 4 }
  0xef   :  { %2203 = vpow2.f32 %v2163_v59  ;;  %v2164_v50 = vmul.f32 -1.442695, %v255_v57  ;;  %v2165_v56 = vmul.f32 -1.442695, %v266_v60 }
  0xf1   :  { %2205 = vpow2.f32 %v2164_v50 }
  0xf2   :  { %2207 = vpow2.f32 %v2165_v56 }
  0xfc   :  { %v2204_v49 = vpop.eup %2203 }
  0xfd   :  { %v251_v54 = vadd.f32 1.0, %v2204_v49 }
  0xfe   :  { %v2206_v55 = vpop.eup %2205 }
  0xff   :  { %2209 = vrcp.f32 %v251_v54  ;;  %v260_v51 = vadd.f32 1.0, %v2206_v55  ;;  %v2208_v52 = vpop.eup %2207 }
 0x100   :  { %2211 = vtanh.f32 %v263_v61  ;;  %v271_v1 = vadd.f32 1.0, %v2208_v52 }
 0x101   :  { %2213 = vrcp.f32 %v260_v51 }
 0x102   :  { %2215 = vrcp.f32 %v271_v1  ;;  %v2915_v1 = vld [vmem:[%s3712_s1 + $0x1c8] sm:$0xff] }
 0x10c   :  { %v2210_v63 = vpop.eup %2209 }
 0x10d   :  { %v2212_v53 = vpop.eup %2211 }
 0x10e   :  { %v2214_v0 = vpop.eup %2213  ;;  %v276_v57 = vmul.f32 %v2212_v53, %v2210_v63  ;;  %v2891_v63 = vld [vmem:[%s3712_s1 + $0x1e8] sm:$0xff]  ;;  %v2903_v53 = vld [vmem:[%s3712_s1 + $0x1e0] sm:$0xff] }
 0x10f   :  { %v275_v59 = vmul.f32 %v2214_v0, %v274_v3  ;;  %v2216_v58 = vpop.eup %2215  ;;  %v2896_v3 = vld [vmem:[%s3712_s1 + $0x1f8] sm:$0xff]  ;;  %v2908_v0 = vld [vmem:[%s3712_s1 + $0x1f0] sm:$0xff] }
 0x111   :  { %v277_v50 = vadd.f32 %v276_v57, %v275_v59  ;;  %v2920_v59 = vld [vmem:[%s3712_s1 + $0x1d8] sm:$0xff]  ;;  %v2927_v57 = vld [vmem:[%s3712_s1 + $0x1c0] sm:$0xff] }
 0x113   :  { %2217 = vtanh.f32 %v277_v50  ;;  %280 = vst [vmem:[#allocation3] sm:$0x3] %v277_v50  ;;  %v2932_v50 = vld [vmem:[%s3712_s1 + $0x1d0] sm:$0xff] }
 0x120   :  { %v2218_v49 = vpop.eup %2217 }
 0x121   :  { %v279_v60 = vmul.f32 %v2218_v49, %v2216_v58  ;;  %v2939_v58 = vld [vmem:[%s3712_s1 + $0x1a8] sm:$0xff]  ;;  %v2944_v49 = vld [vmem:[%s3712_s1 + $0x1b8] sm:$0xff] }
 0x123   :  { %281 = vst [vmem:[#allocation2] sm:$0x3] %v279_v60  ;;  %282 = vst [vmem:[%s3714_s2] sm:$0x3] %v279_v60  ;;  %v2951_v60 = vld [vmem:[%s3712_s1 + $0x1a0] sm:$0xff] }
 0x12a   :  { %v285_v56 = vld [vmem:[#allocation2] sm:$0x3] }
 0x12b   :  { %415 = vmatmul.mubr.f32.vlgmr.msra.gmra.mxu0 %v285_v56  ;;  %486 = vmatmul.mubr.f32.vlgmr.msra.gmra.mxu1 %v285_v56  ;;  %v2956_v56 = vld [vmem:[%s3712_s1 + $0x1b0] sm:$0xff] }
 0x12c   :  { %619 = vmatpush1.msra.mxu0 %v2361_v2  ;;  %690 = vmatpush1.msra.mxu1 %v2372_v4  ;;  %v3792_v2 = vld [vmem:[#allocation4_spill] sm:$0xff]  ;;  %v3793_v4 = vld [vmem:[#allocation5_spill] sm:$0xff] }
 0x12d   :  { %620 = vmatprep.subr.mxu0 %v2377_v5  ;;  %691 = vmatprep.subr.mxu1 %v2382_v6  ;;  %v3794_v5 = vld [vmem:[#allocation6_spill] sm:$0xff]  ;;  %v3795_v6 = vld [vmem:[#allocation7_spill] sm:$0xff]  ;;  %3809 = vst [vmem:[#allocation4_spill] sm:$0xff] %v2891_v63  ;;  %3810 = vst [vmem:[#allocation5_spill] sm:$0xff] %v2896_v3 }
 0x12e   :  { %621 = vmatpush1.msra.mxu0 %v2389_v7  ;;  %692 = vmatpush1.msra.mxu1 %v2394_v8  ;;  %v3796_v7 = vld [vmem:[#allocation8_spill] sm:$0xff]  ;;  %v3797_v8 = vld [vmem:[#allocation9_spill] sm:$0xff] }
 0x12f   :  { %622 = vmatprep.subr.mxu0 %v2399_v9  ;;  %693 = vmatprep.subr.mxu1 %v2406_v10  ;;  %v3798_v9 = vld [vmem:[#allocation10_spill] sm:$0xff]  ;;  %v3799_v10 = vld [vmem:[#allocation11_spill] sm:$0xff] }
 0x130   :  { %623 = vmatpush1.msra.mxu0 %v2411_v11  ;;  %694 = vmatpush1.msra.mxu1 %v2416_v12  ;;  %v3800_v11 = vld [vmem:[#allocation12_spill] sm:$0xff]  ;;  %v3801_v12 = vld [vmem:[#allocation13_spill] sm:$0xff] }
 0x131   :  { %624 = vmatprep.subr.mxu0 %v2423_v13  ;;  %695 = vmatprep.subr.mxu1 %v2428_v14  ;;  %v3802_v13 = vld [vmem:[#allocation14_spill] sm:$0xff]  ;;  %v3803_v14 = vld [vmem:[#allocation15_spill] sm:$0xff] }
 0x132   :  { %625 = vmatpush1.msra.mxu0 %v2435_v15  ;;  %696 = vmatpush1.msra.mxu1 %v2440_v16  ;;  %v3804_v15 = vld [vmem:[#allocation16_spill] sm:$0xff]  ;;  %v3805_v16 = vld [vmem:[#allocation17_spill] sm:$0xff] }
 0x133   :  { %626 = vmatprep.subr.mxu0 %v2447_v17  ;;  %697 = vmatprep.subr.mxu1 %v2452_v18  ;;  %v3806_v17 = vld [vmem:[#allocation18_spill] sm:$0xff]  ;;  %v3807_v18 = vmov 0.0  }
 0x134   :  { %627 = vmatpush1.msra.mxu0 %v2459_v19  ;;  %698 = vmatpush1.msra.mxu1 %v2464_v20  ;;  %v3808_v19 = vld [vmem:[#allocation19_spill] sm:$0xff] }
 0x135   :  { %628 = vmatprep.subr.mxu0 %v2471_v21  ;;  %699 = vmatprep.subr.mxu1 %v2476_v22 }
 0x136   :  { %629 = vmatpush1.msra.mxu0 %v2483_v23  ;;  %700 = vmatpush1.msra.mxu1 %v2488_v24 }
 0x137   :  { %630 = vmatprep.subr.mxu0 %v2495_v25  ;;  %701 = vmatprep.subr.mxu1 %v2500_v26 }
 0x138   :  { %631 = vmatpush1.msra.mxu0 %v2507_v27  ;;  %702 = vmatpush1.msra.mxu1 %v2512_v28  ;;  %v2166_v28 = vld [vmem:[%s3713_s0 + $0x8] sm:$0xff] }
 0x139   :  { %632 = vmatprep.subr.mxu0 %v2519_v29  ;;  %703 = vmatprep.subr.mxu1 %v2524_v30 }
 0x13a   :  { %633 = vmatpush1.msra.mxu0 %v2531_v31  ;;  %704 = vmatpush1.msra.mxu1 %v2536_v32 }
 0x13b   :  { %634 = vmatprep.subr.mxu0 %v2543_v33  ;;  %705 = vmatprep.subr.mxu1 %v2548_v34 }
 0x13c   :  { %635 = vmatpush1.msra.mxu0 %v2555_v35  ;;  %706 = vmatpush1.msra.mxu1 %v2560_v36 }
 0x13d   :  { %636 = vmatprep.subr.mxu0 %v2567_v37  ;;  %707 = vmatprep.subr.mxu1 %v2572_v38 }
 0x13e   :  { %637 = vmatpush1.msra.mxu0 %v2579_v39  ;;  %708 = vmatpush1.msra.mxu1 %v2584_v40 }
 0x13f   :  { %638 = vmatprep.subr.mxu0 %v2591_v41  ;;  %709 = vmatprep.subr.mxu1 %v2596_v42 }
 0x140   :  { %639 = vmatpush1.msra.mxu0 %v2603_v43  ;;  %710 = vmatpush1.msra.mxu1 %v2608_v44 }
 0x141   :  { %640 = vmatprep.subr.mxu0 %v2615_v45  ;;  %711 = vmatprep.subr.mxu1 %v2620_v46  ;;  %v541_v46 = vld [vmem:[#allocation3] sm:$0x3] }
 0x142   :  { %641 = vmatpush1.msra.mxu0 %v2627_v47  ;;  %712 = vmatpush1.msra.mxu1 %v2632_v48 }
 0x143   :  { %642 = vmatprep.subr.mxu0 %v3792_v2  ;;  %713 = vmatprep.subr.mxu1 %v3793_v4  ;;  %v2963_v2 = vld [vmem:[%s3712_s1 + $0x188] sm:$0xff]  ;;  %v2968_v4 = vld [vmem:[%s3712_s1 + $0x198] sm:$0xff] }
 0x144   :  { %643 = vmatpush1.msra.mxu0 %v3794_v5  ;;  %714 = vmatpush1.msra.mxu1 %v3795_v6  ;;  %v2975_v5 = vld [vmem:[%s3712_s1 + $0x180] sm:$0xff]  ;;  %v2980_v6 = vld [vmem:[%s3712_s1 + $0x190] sm:$0xff] }
 0x145   :  { %644 = vmatprep.subr.mxu0 %v3796_v7  ;;  %715 = vmatprep.subr.mxu1 %v3797_v8  ;;  %v2987_v7 = vld [vmem:[%s3712_s1 + $0x168] sm:$0xff]  ;;  %v2992_v8 = vld [vmem:[%s3712_s1 + $0x178] sm:$0xff] }
 0x146   :  { %645 = vmatpush1.msra.mxu0 %v3798_v9  ;;  %716 = vmatpush1.msra.mxu1 %v3799_v10  ;;  %v2999_v9 = vld [vmem:[%s3712_s1 + $0x160] sm:$0xff]  ;;  %v3004_v10 = vld [vmem:[%s3712_s1 + $0x170] sm:$0xff] }
 0x147   :  { %646 = vmatprep.subr.mxu0 %v3800_v11  ;;  %717 = vmatprep.subr.mxu1 %v3801_v12  ;;  %v3011_v11 = vld [vmem:[%s3712_s1 + $0x148] sm:$0xff]  ;;  %v3016_v12 = vld [vmem:[%s3712_s1 + $0x158] sm:$0xff] }
 0x148   :  { %647 = vmatpush1.msra.mxu0 %v3802_v13  ;;  %718 = vmatpush1.msra.mxu1 %v3803_v14  ;;  %v3023_v13 = vld [vmem:[%s3712_s1 + $0x140] sm:$0xff]  ;;  %v3028_v14 = vld [vmem:[%s3712_s1 + $0x150] sm:$0xff] }
 0x149   :  { %648 = vmatprep.subr.mxu0 %v3804_v15  ;;  %719 = vmatprep.subr.mxu1 %v3805_v16  ;;  %v3035_v15 = vld [vmem:[%s3712_s1 + $0x128] sm:$0xff]  ;;  %v3040_v16 = vld [vmem:[%s3712_s1 + $0x138] sm:$0xff] }
 0x14a   :  { %649 = vmatpush1.msra.mxu0 %v3806_v17  ;;  %682 = vmatprep.mubr.f32.mxu0 %v3807_v18  ;;  %v3047_v17 = vld [vmem:[%s3712_s1 + $0x120] sm:$0xff] }
 0x14b   :  { %720 = vmatpush1.msra.mxu1 %v3808_v19  ;;  %753 = vmatprep.mubr.f32.mxu1 %v3807_v18  ;;  %v3052_v19 = vld [vmem:[%s3712_s1 + $0x130] sm:$0xff] }
 0x14c   :  { %886 = vmatprep.subr.mxu0 %v2891_v63  ;;  %957 = vmatprep.subr.mxu1 %v2896_v3 }
 0x1eb   :  { %v416_v20 = vpop.f32.mrf.mxu0  ;;  %v487_v21 = vpop.f32.mrf.mxu1 }
 0x1ed   :  { %v418_v22 = vpop.f32.mrf.mxu0  ;;  %v489_v23 = vpop.f32.mrf.mxu1 }
 0x1ee   :  { %v496_v24 = vcombine.low %v416_v20, %v418_v22  ;;  %v497_v25 = vcombine.low %v487_v21, %v489_v23  ;;  %v3059_v20 = vld [vmem:[%s3712_s1 + $0x108] sm:$0xff]  ;;  %v3064_v21 = vld [vmem:[%s3712_s1 + $0x118] sm:$0xff]  ;;  %v3071_v22 = vld [vmem:[%s3712_s1 + $0x100] sm:$0xff] }
 0x1ef   :  { %v3076_v23 = vld [vmem:[%s3712_s1 + $0x110] sm:$0xff] }
 0x1f0   :  { %v504_v26 = vrot.slane %v496_v24, %v2804_v62  ;;  %v511_v27 = vrot.slane %v497_v25, %v2804_v62  ;;  %v3083_v24 = vld [vmem:[%s3712_s1 + $0xe8] sm:$0xff]  ;;  %v3088_v25 = vld [vmem:[%s3712_s1 + $0xf8] sm:$0xff] }
 0x1f2   :  { %v512_v29 = vcombine.low %v504_v26, %v511_v27  ;;  %v3095_v26 = vld [vmem:[%s3712_s1 + $0xe0] sm:$0xff]  ;;  %v3100_v27 = vld [vmem:[%s3712_s1 + $0xf0] sm:$0xff] }
 0x1f4   :  { %v514_v30 = vadd.f32 %v2166_v28, %v512_v29  ;;  %v3107_v28 = vld [vmem:[%s3712_s1 + $0xc8] sm:$0xff]  ;;  %v3112_v29 = vld [vmem:[%s3712_s1 + $0xd8] sm:$0xff] }
 0x1f6   :  { %v2167_v31 = vmul.f32 -1.442695, %v514_v30  ;;  %v522_v32 = vrot.slane %v514_v30, 2  ;;  %v533_v34 = vrot.slane %v514_v30, 6  ;;  %v530_v37 = vrot.slane %v514_v30, 4  ;;  %v3119_v30 = vld [vmem:[%s3712_s1 + $0xc0] sm:$0xff] }
 0x1f8   :  { %2219 = vpow2.f32 %v2167_v31  ;;  %v2168_v33 = vmul.f32 -1.442695, %v522_v32  ;;  %v2169_v35 = vmul.f32 -1.442695, %v533_v34  ;;  %v3124_v31 = vld [vmem:[%s3712_s1 + $0xd0] sm:$0xff]  ;;  %v3131_v32 = vld [vmem:[%s3712_s1 + $0xa8] sm:$0xff] }
 0x1f9   :  { %v3143_v34 = vld [vmem:[%s3712_s1 + $0xa0] sm:$0xff] }
 0x1fa   :  { %2221 = vpow2.f32 %v2168_v33  ;;  %v3136_v33 = vld [vmem:[%s3712_s1 + $0xb8] sm:$0xff] }
 0x1fb   :  { %2223 = vpow2.f32 %v2169_v35  ;;  %v3148_v35 = vld [vmem:[%s3712_s1 + $0xb0] sm:$0xff] }
 0x205   :  { %v2220_v36 = vpop.eup %2219 }
 0x206   :  { %v518_v38 = vadd.f32 1.0, %v2220_v36  ;;  %v3155_v36 = vld [vmem:[%s3712_s1 + $0x88] sm:$0xff] }
 0x207   :  { %v2222_v39 = vpop.eup %2221 }
 0x208   :  { %2225 = vrcp.f32 %v518_v38  ;;  %v527_v40 = vadd.f32 1.0, %v2222_v39  ;;  %v2224_v41 = vpop.eup %2223  ;;  %v3167_v38 = vld [vmem:[%s3712_s1 + $0x80] sm:$0xff]  ;;  %v3172_v39 = vld [vmem:[%s3712_s1 + $0x90] sm:$0xff] }
 0x209   :  { %2227 = vtanh.f32 %v530_v37  ;;  %v538_v45 = vadd.f32 1.0, %v2224_v41  ;;  %v3160_v37 = vld [vmem:[%s3712_s1 + $0x98] sm:$0xff] }
 0x20a   :  { %2229 = vrcp.f32 %v527_v40  ;;  %v3179_v40 = vld [vmem:[%s3712_s1 + $0x68] sm:$0xff]  ;;  %v3184_v41 = vld [vmem:[%s3712_s1 + $0x78] sm:$0xff] }
 0x20b   :  { %2231 = vrcp.f32 %v538_v45  ;;  %3811 = vst [vmem:[#allocation6_spill] sm:$0xff] %v3179_v40  ;;  %3812 = vst [vmem:[#allocation7_spill] sm:$0xff] %v3184_v41  ;;  %v3206_v45 = vld [vmem:[%s3712_s1 + $0x58] sm:$0xff] }
 0x20c   :  { %3816 = vst [vmem:[#allocation11_spill] sm:$0xff] %v3206_v45 }
 0x215   :  { %v2226_v42 = vpop.eup %2225 }
 0x216   :  { %v2228_v43 = vpop.eup %2227 }
 0x217   :  { %v2230_v44 = vpop.eup %2229  ;;  %v543_v48 = vmul.f32 %v2228_v43, %v2226_v42  ;;  %v3189_v42 = vld [vmem:[%s3712_s1 + $0x60] sm:$0xff]  ;;  %v3196_v43 = vld [vmem:[%s3712_s1 + $0x70] sm:$0xff] }
 0x218   :  { %v542_v47 = vmul.f32 %v2230_v44, %v541_v46  ;;  %v2232_v54 = vpop.eup %2231  ;;  %3813 = vst [vmem:[#allocation8_spill] sm:$0xff] %v3189_v42  ;;  %3814 = vst [vmem:[#allocation9_spill] sm:$0xff] %v3196_v43  ;;  %v3201_v44 = vld [vmem:[%s3712_s1 + $0x48] sm:$0xff]  ;;  %v3213_v46 = vld [vmem:[%s3712_s1 + $0x40] sm:$0xff] }
 0x219   :  { %3815 = vst [vmem:[#allocation10_spill] sm:$0xff] %v3201_v44  ;;  %3817 = vst [vmem:[#allocation12_spill] sm:$0xff] %v3213_v46 }
 0x21a   :  { %v544_v61 = vadd.f32 %v543_v48, %v542_v47  ;;  %v3218_v47 = vld [vmem:[%s3712_s1 + $0x50] sm:$0xff]  ;;  %v3223_v48 = vld [vmem:[%s3712_s1 + $0x28] sm:$0xff] }
 0x21b   :  { %3818 = vst [vmem:[#allocation13_spill] sm:$0xff] %v3218_v47  ;;  %3819 = vst [vmem:[#allocation14_spill] sm:$0xff] %v3223_v48 }
 0x21c   :  { %2233 = vtanh.f32 %v544_v61  ;;  %547 = vst [vmem:[#allocation3] sm:$0x3] %v544_v61  ;;  %v3230_v61 = vld [vmem:[%s3712_s1 + $0x38] sm:$0xff] }
 0x21d   :  { %3820 = vst [vmem:[#allocation15_spill] sm:$0xff] %v3230_v61 }
 0x229   :  { %v2234_v55 = vpop.eup %2233 }
 0x22a   :  { %v546_v51 = vmul.f32 %v2234_v55, %v2232_v54  ;;  %v3235_v54 = vld [vmem:[%s3712_s1 + $0x20] sm:$0xff]  ;;  %v3240_v55 = vld [vmem:[%s3712_s1 + $0x30] sm:$0xff] }
 0x22b   :  { %3821 = vst [vmem:[#allocation16_spill] sm:$0xff] %v3235_v54  ;;  %3822 = vst [vmem:[#allocation17_spill] sm:$0xff] %v3240_v55 }
 0x22c   :  { %548 = vst [vmem:[#allocation2] sm:$0x3] %v546_v51  ;;  %2170 = vst [vmem:[%s3714_s2 + $0x2] sm:$0x3] %v546_v51  ;;  %v3247_v51 = vld [vmem:[%s3712_s1 + $0x8] sm:$0xff] }
 0x22d   :  { %3823 = vst [vmem:[#allocation18_spill] sm:$0xff] %v3247_v51 }
 0x233   :  { %v553_v52 = vld [vmem:[#allocation2] sm:$0x3] }
 0x234   :  { %683 = vmatmul.mubr.f32.vlgmr.msra.gmra.mxu0 %v553_v52  ;;  %754 = vmatmul.mubr.f32.vlgmr.msra.gmra.mxu1 %v553_v52  ;;  %v3252_v52 = vld [vmem:[%s3712_s1 + $0x18] sm:$0xff] }
 0x235   :  { %950 = vmatprep.mubr.f32.mxu0 %v3807_v18  ;;  %1021 = vmatprep.mubr.f32.mxu1 %v3807_v18  ;;  %3824 = vst [vmem:[#allocation19_spill] sm:$0xff] %v3252_v52  ;;  %v3259_v18 = vld [vmem:[%s3712_s1] sm:$0xff] }
 0x236   :  { %887 = vmatpush1.msra.mxu0 %v2903_v53  ;;  %958 = vmatpush1.msra.mxu1 %v2908_v0  ;;  %3825 = vst [vmem:[#allocation20_spill] sm:$0xff] %v3259_v18 }
 0x237   :  { %888 = vmatprep.subr.mxu0 %v2915_v1  ;;  %959 = vmatprep.subr.mxu1 %v2920_v59 }
 0x238   :  { %889 = vmatpush1.msra.mxu0 %v2927_v57  ;;  %960 = vmatpush1.msra.mxu1 %v2932_v50 }
 0x239   :  { %890 = vmatprep.subr.mxu0 %v2939_v58  ;;  %961 = vmatprep.subr.mxu1 %v2944_v49 }
 0x23a   :  { %891 = vmatpush1.msra.mxu0 %v2951_v60  ;;  %962 = vmatpush1.msra.mxu1 %v2956_v56 }
 0x23b   :  { %892 = vmatprep.subr.mxu0 %v2963_v2  ;;  %963 = vmatprep.subr.mxu1 %v2968_v4 }
 0x23c   :  { %893 = vmatpush1.msra.mxu0 %v2975_v5  ;;  %964 = vmatpush1.msra.mxu1 %v2980_v6 }
 0x23d   :  { %894 = vmatprep.subr.mxu0 %v2987_v7  ;;  %965 = vmatprep.subr.mxu1 %v2992_v8 }
 0x23e   :  { %895 = vmatpush1.msra.mxu0 %v2999_v9  ;;  %966 = vmatpush1.msra.mxu1 %v3004_v10 }
 0x23f   :  { %896 = vmatprep.subr.mxu0 %v3011_v11  ;;  %967 = vmatprep.subr.mxu1 %v3016_v12 }
 0x240   :  { %897 = vmatpush1.msra.mxu0 %v3023_v13  ;;  %968 = vmatpush1.msra.mxu1 %v3028_v14 }
 0x241   :  { %898 = vmatprep.subr.mxu0 %v3035_v15  ;;  %969 = vmatprep.subr.mxu1 %v3040_v16 }
 0x242   :  { %899 = vmatpush1.msra.mxu0 %v3047_v17  ;;  %970 = vmatpush1.msra.mxu1 %v3052_v19 }
 0x243   :  { %900 = vmatprep.subr.mxu0 %v3059_v20  ;;  %971 = vmatprep.subr.mxu1 %v3064_v21 }
 0x244   :  { %901 = vmatpush1.msra.mxu0 %v3071_v22  ;;  %972 = vmatpush1.msra.mxu1 %v3076_v23 }
 0x245   :  { %902 = vmatprep.subr.mxu0 %v3083_v24  ;;  %973 = vmatprep.subr.mxu1 %v3088_v25 }
 0x246   :  { %903 = vmatpush1.msra.mxu0 %v3095_v26  ;;  %974 = vmatpush1.msra.mxu1 %v3100_v27 }
 0x247   :  { %904 = vmatprep.subr.mxu0 %v3107_v28  ;;  %975 = vmatprep.subr.mxu1 %v3112_v29 }
 0x248   :  { %905 = vmatpush1.msra.mxu0 %v3119_v30  ;;  %976 = vmatpush1.msra.mxu1 %v3124_v31 }
 0x249   :  { %906 = vmatprep.subr.mxu0 %v3131_v32  ;;  %977 = vmatprep.subr.mxu1 %v3136_v33 }
 0x24a   :  { %907 = vmatpush1.msra.mxu0 %v3143_v34  ;;  %978 = vmatpush1.msra.mxu1 %v3148_v35 }
 0x24b   :  { %908 = vmatprep.subr.mxu0 %v3155_v36  ;;  %979 = vmatprep.subr.mxu1 %v3160_v37 }
 0x24c   :  { %909 = vmatpush1.msra.mxu0 %v3167_v38  ;;  %980 = vmatpush1.msra.mxu1 %v3172_v39 }
 0x24d   :  { %910 = vmatprep.subr.mxu0 %v3179_v40  ;;  %981 = vmatprep.subr.mxu1 %v3184_v41 }
 0x24e   :  { %911 = vmatpush1.msra.mxu0 %v3189_v42  ;;  %982 = vmatpush1.msra.mxu1 %v3196_v43 }
 0x24f   :  { %912 = vmatprep.subr.mxu0 %v3201_v44  ;;  %983 = vmatprep.subr.mxu1 %v3206_v45 }
 0x250   :  { %913 = vmatpush1.msra.mxu0 %v3213_v46  ;;  %984 = vmatpush1.msra.mxu1 %v3218_v47  ;;  %v3264_v47 = vld [vmem:[%s3712_s1 + $0x10] sm:$0xff] }
 0x251   :  { %914 = vmatprep.subr.mxu0 %v3223_v48  ;;  %985 = vmatprep.subr.mxu1 %v3230_v61  ;;  %3826 = vst [vmem:[#allocation21_spill] sm:$0xff] %v3264_v47 }
 0x252   :  { %915 = vmatpush1.msra.mxu0 %v3235_v54  ;;  %986 = vmatpush1.msra.mxu1 %v3240_v55 }
 0x253   :  { %916 = vmatprep.subr.mxu0 %v3247_v51  ;;  %987 = vmatprep.subr.mxu1 %v3252_v52 }
 0x254   :  { %917 = vmatpush1.msra.mxu0 %v3259_v18  ;;  %988 = vmatpush1.msra.mxu1 %v3264_v47  ;;  %v2171_v18 = vld [vmem:[%s3713_s0 + $0x10] sm:$0xff] }
 0x255   :  { %1154 = vmatprep.subr.mxu0 %v2891_v63  ;;  %1225 = vmatprep.subr.mxu1 %v2896_v3 }
 0x2f4   :  { %v684_v61 = vpop.f32.mrf.mxu0  ;;  %v755_v48 = vpop.f32.mrf.mxu1 }
 0x2f6   :  { %v686_v46 = vpop.f32.mrf.mxu0  ;;  %v757_v45 = vpop.f32.mrf.mxu1 }
 0x2f7   :  { %v764_v44 = vcombine.low %v684_v61, %v686_v46  ;;  %v765_v54 = vcombine.low %v755_v48, %v757_v45 }
 0x2f9   :  { %v772_v55 = vrot.slane %v764_v44, %v2804_v62  ;;  %v779_v51 = vrot.slane %v765_v54, %v2804_v62 }
 0x2fb   :  { %v780_v52 = vcombine.low %v772_v55, %v779_v51 }
 0x2fd   :  { %v782_v47 = vadd.f32 %v2171_v18, %v780_v52  ;;  %v809_v52 = vld [vmem:[#allocation3] sm:$0x3] }
 0x2ff   :  { %v2172_v43 = vmul.f32 -1.442695, %v782_v47  ;;  %v790_v63 = vrot.slane %v782_v47, 2  ;;  %v801_v42 = vrot.slane %v782_v47, 6  ;;  %v798_v46 = vrot.slane %v782_v47, 4 }
 0x301   :  { %2235 = vpow2.f32 %v2172_v43  ;;  %v2173_v3 = vmul.f32 -1.442695, %v790_v63  ;;  %v2174_v41 = vmul.f32 -1.442695, %v801_v42 }
 0x303   :  { %2237 = vpow2.f32 %v2173_v3 }
 0x304   :  { %2239 = vpow2.f32 %v2174_v41 }
 0x30e   :  { %v2236_v40 = vpop.eup %2235 }
 0x30f   :  { %v786_v45 = vadd.f32 1.0, %v2236_v40 }
 0x310   :  { %v2238_v48 = vpop.eup %2237 }
 0x311   :  { %2241 = vrcp.f32 %v786_v45  ;;  %v795_v44 = vadd.f32 1.0, %v2238_v48  ;;  %v2240_v61 = vpop.eup %2239  ;;  %v3828_v45 = vld [vmem:[#allocation7_spill] sm:$0xff]  ;;  %v3829_v48 = vld [vmem:[#allocation8_spill] sm:$0xff] }
 0x312   :  { %2243 = vtanh.f32 %v798_v46  ;;  %v806_v51 = vadd.f32 1.0, %v2240_v61  ;;  %v3827_v46 = vld [vmem:[#allocation6_spill] sm:$0xff] }
 0x313   :  { %2245 = vrcp.f32 %v795_v44  ;;  %v3830_v44 = vld [vmem:[#allocation9_spill] sm:$0xff]  ;;  %v3831_v61 = vld [vmem:[#allocation10_spill] sm:$0xff] }
 0x314   :  { %2247 = vrcp.f32 %v806_v51  ;;  %v3835_v51 = vld [vmem:[#allocation14_spill] sm:$0xff] }
 0x31e   :  { %v2242_v54 = vpop.eup %2241 }
 0x31f   :  { %v2244_v55 = vpop.eup %2243 }
 0x320   :  { %v2246_v18 = vpop.eup %2245  ;;  %v811_v63 = vmul.f32 %v2244_v55, %v2242_v54  ;;  %v3832_v54 = vld [vmem:[#allocation11_spill] sm:$0xff]  ;;  %v3833_v55 = vld [vmem:[#allocation12_spill] sm:$0xff] }
 0x321   :  { %v810_v43 = vmul.f32 %v2246_v18, %v809_v52  ;;  %v2248_v42 = vpop.eup %2247  ;;  %v3834_v18 = vld [vmem:[#allocation13_spill] sm:$0xff]  ;;  %v3836_v52 = vld [vmem:[#allocation15_spill] sm:$0xff] }
 0x323   :  { %v812_v3 = vadd.f32 %v811_v63, %v810_v43  ;;  %v3837_v43 = vld [vmem:[#allocation16_spill] sm:$0xff]  ;;  %v3838_v63 = vld [vmem:[#allocation17_spill] sm:$0xff] }
 0x325   :  { %2249 = vtanh.f32 %v812_v3  ;;  %815 = vst [vmem:[#allocation3] sm:$0x3] %v812_v3  ;;  %v3839_v3 = vld [vmem:[#allocation18_spill] sm:$0xff] }
 0x332   :  { %v2250_v40 = vpop.eup %2249 }
 0x333   :  { %v814_v47 = vmul.f32 %v2250_v40, %v2248_v42  ;;  %v3840_v42 = vld [vmem:[#allocation19_spill] sm:$0xff]  ;;  %v3841_v40 = vld [vmem:[#allocation20_spill] sm:$0xff] }
 0x335   :  { %2175 = vst [vmem:[%s3714_s2 + $0x4] sm:$0x3] %v814_v47  ;;  %816 = vst [vmem:[#allocation2] sm:$0x3] %v814_v47  ;;  %v3842_v47 = vmov 0.0  }
 0x33c   :  { %v821_v41 = vld [vmem:[#allocation2] sm:$0x3] }
 0x33d   :  { %951 = vmatmul.mubr.f32.vlgmr.msra.gmra.mxu0 %v821_v41  ;;  %1022 = vmatmul.mubr.f32.vlgmr.msra.gmra.mxu1 %v821_v41  ;;  %v3843_v41 = vld [vmem:[#allocation21_spill] sm:$0xff] }
 0x33e   :  { %1155 = vmatpush1.msra.mxu0 %v2903_v53  ;;  %1226 = vmatpush1.msra.mxu1 %v2908_v0 }
 0x33f   :  { %1156 = vmatprep.subr.mxu0 %v2915_v1  ;;  %1227 = vmatprep.subr.mxu1 %v2920_v59 }
 0x340   :  { %1157 = vmatpush1.msra.mxu0 %v2927_v57  ;;  %1228 = vmatpush1.msra.mxu1 %v2932_v50 }
 0x341   :  { %1158 = vmatprep.subr.mxu0 %v2939_v58  ;;  %1229 = vmatprep.subr.mxu1 %v2944_v49 }
 0x342   :  { %1159 = vmatpush1.msra.mxu0 %v2951_v60  ;;  %1230 = vmatpush1.msra.mxu1 %v2956_v56 }
 0x343   :  { %1160 = vmatprep.subr.mxu0 %v2963_v2  ;;  %1231 = vmatprep.subr.mxu1 %v2968_v4 }
 0x344   :  { %1161 = vmatpush1.msra.mxu0 %v2975_v5  ;;  %1232 = vmatpush1.msra.mxu1 %v2980_v6 }
 0x345   :  { %1162 = vmatprep.subr.mxu0 %v2987_v7  ;;  %1233 = vmatprep.subr.mxu1 %v2992_v8 }
 0x346   :  { %1163 = vmatpush1.msra.mxu0 %v2999_v9  ;;  %1234 = vmatpush1.msra.mxu1 %v3004_v10 }
 0x347   :  { %1164 = vmatprep.subr.mxu0 %v3011_v11  ;;  %1235 = vmatprep.subr.mxu1 %v3016_v12 }
 0x348   :  { %1165 = vmatpush1.msra.mxu0 %v3023_v13  ;;  %1236 = vmatpush1.msra.mxu1 %v3028_v14 }
 0x349   :  { %1166 = vmatprep.subr.mxu0 %v3035_v15  ;;  %1237 = vmatprep.subr.mxu1 %v3040_v16 }
 0x34a   :  { %1167 = vmatpush1.msra.mxu0 %v3047_v17  ;;  %1238 = vmatpush1.msra.mxu1 %v3052_v19 }
 0x34b   :  { %1168 = vmatprep.subr.mxu0 %v3059_v20  ;;  %1239 = vmatprep.subr.mxu1 %v3064_v21 }
 0x34c   :  { %1169 = vmatpush1.msra.mxu0 %v3071_v22  ;;  %1240 = vmatpush1.msra.mxu1 %v3076_v23 }
 0x34d   :  { %1170 = vmatprep.subr.mxu0 %v3083_v24  ;;  %1241 = vmatprep.subr.mxu1 %v3088_v25 }
 0x34e   :  { %1171 = vmatpush1.msra.mxu0 %v3095_v26  ;;  %1242 = vmatpush1.msra.mxu1 %v3100_v27 }
 0x34f   :  { %1172 = vmatprep.subr.mxu0 %v3107_v28  ;;  %1243 = vmatprep.subr.mxu1 %v3112_v29 }
 0x350   :  { %1173 = vmatpush1.msra.mxu0 %v3119_v30  ;;  %1244 = vmatpush1.msra.mxu1 %v3124_v31 }
 0x351   :  { %1174 = vmatprep.subr.mxu0 %v3131_v32  ;;  %1245 = vmatprep.subr.mxu1 %v3136_v33 }
 0x352   :  { %1175 = vmatpush1.msra.mxu0 %v3143_v34  ;;  %1246 = vmatpush1.msra.mxu1 %v3148_v35 }
 0x353   :  { %1176 = vmatprep.subr.mxu0 %v3155_v36  ;;  %1247 = vmatprep.subr.mxu1 %v3160_v37 }
 0x354   :  { %1177 = vmatpush1.msra.mxu0 %v3167_v38  ;;  %1248 = vmatpush1.msra.mxu1 %v3172_v39 }
 0x355   :  { %1178 = vmatprep.subr.mxu0 %v3827_v46  ;;  %1249 = vmatprep.subr.mxu1 %v3828_v45 }
 0x356   :  { %1179 = vmatpush1.msra.mxu0 %v3829_v48  ;;  %1250 = vmatpush1.msra.mxu1 %v3830_v44 }
 0x357   :  { %1180 = vmatprep.subr.mxu0 %v3831_v61  ;;  %1251 = vmatprep.subr.mxu1 %v3832_v54 }
 0x358   :  { %1181 = vmatpush1.msra.mxu0 %v3833_v55  ;;  %1252 = vmatpush1.msra.mxu1 %v3834_v18  ;;  %v3844_v18 = vld [vmem:[#allocation4_spill] sm:$0xff] }
 0x359   :  { %1182 = vmatprep.subr.mxu0 %v3835_v51  ;;  %1253 = vmatprep.subr.mxu1 %v3836_v52  ;;  %v3845_v51 = vld [vmem:[#allocation5_spill] sm:$0xff] }
 0x35a   :  { %1183 = vmatpush1.msra.mxu0 %v3837_v43  ;;  %1254 = vmatpush1.msra.mxu1 %v3838_v63 }
 0x35b   :  { %1184 = vmatprep.subr.mxu0 %v3839_v3  ;;  %1255 = vmatprep.subr.mxu1 %v3840_v42 }
 0x35c   :  { %1185 = vmatpush1.msra.mxu0 %v3841_v40  ;;  %1218 = vmatprep.mubr.f32.mxu0 %v3842_v47 }
 0x35d   :  { %1256 = vmatpush1.msra.mxu1 %v3843_v41  ;;  %1289 = vmatprep.mubr.f32.mxu1 %v3842_v47  ;;  %v2176_v41 = vld [vmem:[%s3713_s0 + $0x18] sm:$0xff] }
 0x35e   :  { %1422 = vmatprep.subr.mxu0 %v3844_v18  ;;  %1493 = vmatprep.subr.mxu1 %v3845_v51 }
 0x3fd   :  { %v952_v52 = vpop.f32.mrf.mxu0  ;;  %v1023_v43 = vpop.f32.mrf.mxu1 }
 0x3ff   :  { %v954_v55 = vpop.f32.mrf.mxu0  ;;  %v1025_v63 = vpop.f32.mrf.mxu1 }
 0x400   :  { %v1032_v54 = vcombine.low %v952_v52, %v954_v55  ;;  %v1033_v3 = vcombine.low %v1023_v43, %v1025_v63 }
 0x402   :  { %v1040_v42 = vrot.slane %v1032_v54, %v2804_v62  ;;  %v1047_v40 = vrot.slane %v1033_v3, %v2804_v62 }
 0x404   :  { %v1048_v61 = vcombine.low %v1040_v42, %v1047_v40 }
 0x406   :  { %v1050_v47 = vadd.f32 %v2176_v41, %v1048_v61  ;;  %v1077_v41 = vld [vmem:[#allocation3] sm:$0x3] }
 0x408   :  { %v2177_v44 = vmul.f32 -1.442695, %v1050_v47  ;;  %v1058_v18 = vrot.slane %v1050_v47, 2  ;;  %v1069_v48 = vrot.slane %v1050_v47, 6  ;;  %v1066_v55 = vrot.slane %v1050_v47, 4 }
 0x40a   :  { %2251 = vpow2.f32 %v2177_v44  ;;  %v2178_v51 = vmul.f32 -1.442695, %v1058_v18  ;;  %v2179_v45 = vmul.f32 -1.442695, %v1069_v48 }
 0x40c   :  { %2253 = vpow2.f32 %v2178_v51 }
 0x40d   :  { %2255 = vpow2.f32 %v2179_v45 }
 0x417   :  { %v2252_v46 = vpop.eup %2251 }
 0x418   :  { %v1054_v52 = vadd.f32 1.0, %v2252_v46 }
 0x419   :  { %v2254_v43 = vpop.eup %2253 }
 0x41a   :  { %2257 = vrcp.f32 %v1054_v52  ;;  %v1063_v54 = vadd.f32 1.0, %v2254_v43  ;;  %v2256_v63 = vpop.eup %2255  ;;  %v3847_v52 = vld [vmem:[#allocation7_spill] sm:$0xff]  ;;  %v3848_v43 = vld [vmem:[#allocation8_spill] sm:$0xff] }
 0x41b   :  { %2259 = vtanh.f32 %v1066_v55  ;;  %v1074_v40 = vadd.f32 1.0, %v2256_v63  ;;  %v3846_v55 = vld [vmem:[#allocation6_spill] sm:$0xff] }
 0x41c   :  { %2261 = vrcp.f32 %v1063_v54  ;;  %v3849_v54 = vld [vmem:[#allocation9_spill] sm:$0xff]  ;;  %v3850_v63 = vld [vmem:[#allocation10_spill] sm:$0xff] }
 0x41d   :  { %2263 = vrcp.f32 %v1074_v40  ;;  %v3854_v40 = vld [vmem:[#allocation14_spill] sm:$0xff] }
 0x427   :  { %v2258_v3 = vpop.eup %2257 }
 0x428   :  { %v2260_v42 = vpop.eup %2259 }
 0x429   :  { %v2262_v61 = vpop.eup %2261  ;;  %v1079_v18 = vmul.f32 %v2260_v42, %v2258_v3  ;;  %v3851_v3 = vld [vmem:[#allocation11_spill] sm:$0xff]  ;;  %v3852_v42 = vld [vmem:[#allocation12_spill] sm:$0xff] }
 0x42a   :  { %v1078_v44 = vmul.f32 %v2262_v61, %v1077_v41  ;;  %v2264_v48 = vpop.eup %2263  ;;  %v3853_v61 = vld [vmem:[#allocation13_spill] sm:$0xff]  ;;  %v3855_v41 = vld [vmem:[#allocation15_spill] sm:$0xff] }
 0x42c   :  { %v1080_v51 = vadd.f32 %v1079_v18, %v1078_v44  ;;  %v3856_v44 = vld [vmem:[#allocation16_spill] sm:$0xff]  ;;  %v3857_v18 = vld [vmem:[#allocation17_spill] sm:$0xff] }
 0x42e   :  { %2265 = vtanh.f32 %v1080_v51  ;;  %1083 = vst [vmem:[#allocation3] sm:$0x3] %v1080_v51  ;;  %v3858_v51 = vld [vmem:[#allocation18_spill] sm:$0xff] }
 0x43b   :  { %v2266_v46 = vpop.eup %2265 }
 0x43c   :  { %v1082_v47 = vmul.f32 %v2266_v46, %v2264_v48  ;;  %v3859_v48 = vld [vmem:[#allocation19_spill] sm:$0xff]  ;;  %v3860_v46 = vld [vmem:[#allocation20_spill] sm:$0xff] }
 0x43e   :  { %2180 = vst [vmem:[%s3714_s2 + $0x6] sm:$0x3] %v1082_v47  ;;  %1084 = vst [vmem:[#allocation2] sm:$0x3] %v1082_v47  ;;  %v3861_v47 = vmov 0.0  }
 0x445   :  { %v1089_v45 = vld [vmem:[#allocation2] sm:$0x3] }
 0x446   :  { %1219 = vmatmul.mubr.f32.vlgmr.msra.gmra.mxu0 %v1089_v45  ;;  %1290 = vmatmul.mubr.f32.vlgmr.msra.gmra.mxu1 %v1089_v45  ;;  %v3862_v45 = vld [vmem:[#allocation21_spill] sm:$0xff] }
 0x447   :  { %1423 = vmatpush1.msra.mxu0 %v2903_v53  ;;  %1494 = vmatpush1.msra.mxu1 %v2908_v0 }
 0x448   :  { %1424 = vmatprep.subr.mxu0 %v2915_v1  ;;  %1495 = vmatprep.subr.mxu1 %v2920_v59 }
 0x449   :  { %1425 = vmatpush1.msra.mxu0 %v2927_v57  ;;  %1496 = vmatpush1.msra.mxu1 %v2932_v50 }
 0x44a   :  { %1426 = vmatprep.subr.mxu0 %v2939_v58  ;;  %1497 = vmatprep.subr.mxu1 %v2944_v49 }
 0x44b   :  { %1427 = vmatpush1.msra.mxu0 %v2951_v60  ;;  %1498 = vmatpush1.msra.mxu1 %v2956_v56 }
 0x44c   :  { %1428 = vmatprep.subr.mxu0 %v2963_v2  ;;  %1499 = vmatprep.subr.mxu1 %v2968_v4 }
 0x44d   :  { %1429 = vmatpush1.msra.mxu0 %v2975_v5  ;;  %1500 = vmatpush1.msra.mxu1 %v2980_v6 }
 0x44e   :  { %1430 = vmatprep.subr.mxu0 %v2987_v7  ;;  %1501 = vmatprep.subr.mxu1 %v2992_v8 }
 0x44f   :  { %1431 = vmatpush1.msra.mxu0 %v2999_v9  ;;  %1502 = vmatpush1.msra.mxu1 %v3004_v10 }
 0x450   :  { %1432 = vmatprep.subr.mxu0 %v3011_v11  ;;  %1503 = vmatprep.subr.mxu1 %v3016_v12 }
 0x451   :  { %1433 = vmatpush1.msra.mxu0 %v3023_v13  ;;  %1504 = vmatpush1.msra.mxu1 %v3028_v14 }
 0x452   :  { %1434 = vmatprep.subr.mxu0 %v3035_v15  ;;  %1505 = vmatprep.subr.mxu1 %v3040_v16 }
 0x453   :  { %1435 = vmatpush1.msra.mxu0 %v3047_v17  ;;  %1506 = vmatpush1.msra.mxu1 %v3052_v19 }
 0x454   :  { %1436 = vmatprep.subr.mxu0 %v3059_v20  ;;  %1507 = vmatprep.subr.mxu1 %v3064_v21 }
 0x455   :  { %1437 = vmatpush1.msra.mxu0 %v3071_v22  ;;  %1508 = vmatpush1.msra.mxu1 %v3076_v23 }
 0x456   :  { %1438 = vmatprep.subr.mxu0 %v3083_v24  ;;  %1509 = vmatprep.subr.mxu1 %v3088_v25 }
 0x457   :  { %1439 = vmatpush1.msra.mxu0 %v3095_v26  ;;  %1510 = vmatpush1.msra.mxu1 %v3100_v27 }
 0x458   :  { %1440 = vmatprep.subr.mxu0 %v3107_v28  ;;  %1511 = vmatprep.subr.mxu1 %v3112_v29 }
 0x459   :  { %1441 = vmatpush1.msra.mxu0 %v3119_v30  ;;  %1512 = vmatpush1.msra.mxu1 %v3124_v31 }
 0x45a   :  { %1442 = vmatprep.subr.mxu0 %v3131_v32  ;;  %1513 = vmatprep.subr.mxu1 %v3136_v33 }
 0x45b   :  { %1443 = vmatpush1.msra.mxu0 %v3143_v34  ;;  %1514 = vmatpush1.msra.mxu1 %v3148_v35 }
 0x45c   :  { %1444 = vmatprep.subr.mxu0 %v3155_v36  ;;  %1515 = vmatprep.subr.mxu1 %v3160_v37 }
 0x45d   :  { %1445 = vmatpush1.msra.mxu0 %v3167_v38  ;;  %1516 = vmatpush1.msra.mxu1 %v3172_v39 }
 0x45e   :  { %1446 = vmatprep.subr.mxu0 %v3846_v55  ;;  %1517 = vmatprep.subr.mxu1 %v3847_v52 }
 0x45f   :  { %1447 = vmatpush1.msra.mxu0 %v3848_v43  ;;  %1518 = vmatpush1.msra.mxu1 %v3849_v54 }
 0x460   :  { %1448 = vmatprep.subr.mxu0 %v3850_v63  ;;  %1519 = vmatprep.subr.mxu1 %v3851_v3 }
 0x461   :  { %1449 = vmatpush1.msra.mxu0 %v3852_v42  ;;  %1520 = vmatpush1.msra.mxu1 %v3853_v61  ;;  %v3863_v61 = vld [vmem:[#allocation4_spill] sm:$0xff] }
 0x462   :  { %1450 = vmatprep.subr.mxu0 %v3854_v40  ;;  %1521 = vmatprep.subr.mxu1 %v3855_v41  ;;  %v3864_v40 = vld [vmem:[#allocation5_spill] sm:$0xff] }
 0x463   :  { %1451 = vmatpush1.msra.mxu0 %v3856_v44  ;;  %1522 = vmatpush1.msra.mxu1 %v3857_v18 }
 0x464   :  { %1452 = vmatprep.subr.mxu0 %v3858_v51  ;;  %1523 = vmatprep.subr.mxu1 %v3859_v48 }
 0x465   :  { %1453 = vmatpush1.msra.mxu0 %v3860_v46  ;;  %1486 = vmatprep.mubr.f32.mxu0 %v3861_v47 }
 0x466   :  { %1524 = vmatpush1.msra.mxu1 %v3862_v45  ;;  %1557 = vmatprep.mubr.f32.mxu1 %v3861_v47  ;;  %v2181_v45 = vld [vmem:[%s3713_s0 + $0x20] sm:$0xff] }
 0x467   :  { %1690 = vmatprep.subr.mxu0 %v3863_v61  ;;  %1761 = vmatprep.subr.mxu1 %v3864_v40 }
 0x506   :  { %v1220_v41 = vpop.f32.mrf.mxu0  ;;  %v1291_v44 = vpop.f32.mrf.mxu1 }
 0x508   :  { %v1222_v42 = vpop.f32.mrf.mxu0  ;;  %v1293_v18 = vpop.f32.mrf.mxu1 }
 0x509   :  { %v1300_v3 = vcombine.low %v1220_v41, %v1222_v42  ;;  %v1301_v51 = vcombine.low %v1291_v44, %v1293_v18 }
 0x50b   :  { %v1308_v48 = vrot.slane %v1300_v3, %v2804_v62  ;;  %v1315_v46 = vrot.slane %v1301_v51, %v2804_v62 }
 0x50d   :  { %v1316_v63 = vcombine.low %v1308_v48, %v1315_v46 }
 0x50f   :  { %v1318_v47 = vadd.f32 %v2181_v45, %v1316_v63  ;;  %v1345_v45 = vld [vmem:[#allocation3] sm:$0x3] }
 0x511   :  { %v2182_v54 = vmul.f32 -1.442695, %v1318_v47  ;;  %v1326_v61 = vrot.slane %v1318_v47, 2  ;;  %v1337_v43 = vrot.slane %v1318_v47, 6  ;;  %v1334_v42 = vrot.slane %v1318_v47, 4 }
 0x513   :  { %2267 = vpow2.f32 %v2182_v54  ;;  %v2183_v40 = vmul.f32 -1.442695, %v1326_v61  ;;  %v2184_v52 = vmul.f32 -1.442695, %v1337_v43 }
 0x515   :  { %2269 = vpow2.f32 %v2183_v40 }
 0x516   :  { %2271 = vpow2.f32 %v2184_v52 }
 0x520   :  { %v2268_v55 = vpop.eup %2267 }
 0x521   :  { %v1322_v41 = vadd.f32 1.0, %v2268_v55 }
 0x522   :  { %v2270_v44 = vpop.eup %2269 }
 0x523   :  { %2273 = vrcp.f32 %v1322_v41  ;;  %v1331_v3 = vadd.f32 1.0, %v2270_v44  ;;  %v2272_v18 = vpop.eup %2271 }
 0x524   :  { %2275 = vtanh.f32 %v1334_v42  ;;  %v1342_v46 = vadd.f32 1.0, %v2272_v18 }
 0x525   :  { %2277 = vrcp.f32 %v1331_v3 }
 0x526   :  { %2279 = vrcp.f32 %v1342_v46  ;;  %v1956_v46 = vld [vmem:[%s3712_s1 + $0x1f0] sm:$0xff] }
 0x530   :  { %v2274_v51 = vpop.eup %2273 }
 0x531   :  { %v2276_v48 = vpop.eup %2275 }
 0x532   :  { %v2278_v63 = vpop.eup %2277  ;;  %v1347_v61 = vmul.f32 %v2276_v48, %v2274_v51  ;;  %v1955_v51 = vld [vmem:[%s3712_s1 + $0x1e8] sm:$0xff]  ;;  %v1957_v48 = vld [vmem:[%s3712_s1 + $0x1f8] sm:$0xff] }
 0x533   :  { %v1346_v54 = vmul.f32 %v2278_v63, %v1345_v45  ;;  %v2280_v43 = vpop.eup %2279  ;;  %v1954_v63 = vld [vmem:[%s3712_s1 + $0x1e0] sm:$0xff]  ;;  %v1951_v45 = vld [vmem:[%s3712_s1 + $0x1c8] sm:$0xff] }
 0x535   :  { %v1348_v40 = vadd.f32 %v1347_v61, %v1346_v54  ;;  %v1953_v54 = vld [vmem:[%s3712_s1 + $0x1d8] sm:$0xff]  ;;  %v1950_v61 = vld [vmem:[%s3712_s1 + $0x1c0] sm:$0xff] }
 0x537   :  { %2281 = vtanh.f32 %v1348_v40  ;;  %1351 = vst [vmem:[#allocation3] sm:$0x3] %v1348_v40  ;;  %v1952_v40 = vld [vmem:[%s3712_s1 + $0x1d0] sm:$0xff] }
 0x544   :  { %v2282_v55 = vpop.eup %2281 }
 0x545   :  { %v1350_v47 = vmul.f32 %v2282_v55, %v2280_v43  ;;  %v1947_v43 = vld [vmem:[%s3712_s1 + $0x1a8] sm:$0xff]  ;;  %v1949_v55 = vld [vmem:[%s3712_s1 + $0x1b8] sm:$0xff] }
 0x547   :  { %2185 = vst [vmem:[%s3714_s2 + $0x8] sm:$0x3] %v1350_v47  ;;  %1352 = vst [vmem:[#allocation2] sm:$0x3] %v1350_v47  ;;  %v1946_v47 = vld [vmem:[%s3712_s1 + $0x1a0] sm:$0xff] }
 0x54e   :  { %v1357_v52 = vld [vmem:[#allocation2] sm:$0x3] }
 0x54f   :  { %1487 = vmatmul.mubr.f32.vlgmr.msra.gmra.mxu0 %v1357_v52  ;;  %1558 = vmatmul.mubr.f32.vlgmr.msra.gmra.mxu1 %v1357_v52  ;;  %v1948_v52 = vld [vmem:[%s3712_s1 + $0x1b0] sm:$0xff] }
 0x550   :  { %1691 = vmatpush1.msra.mxu0 %v2903_v53  ;;  %1762 = vmatpush1.msra.mxu1 %v2908_v0  ;;  %v3865_v53 = vld [vmem:[#allocation6_spill] sm:$0xff]  ;;  %v3866_v0 = vld [vmem:[#allocation7_spill] sm:$0xff] }
 0x551   :  { %1692 = vmatprep.subr.mxu0 %v2915_v1  ;;  %1763 = vmatprep.subr.mxu1 %v2920_v59  ;;  %v3867_v1 = vld [vmem:[#allocation8_spill] sm:$0xff]  ;;  %v3868_v59 = vld [vmem:[#allocation9_spill] sm:$0xff] }
 0x552   :  { %1693 = vmatpush1.msra.mxu0 %v2927_v57  ;;  %1764 = vmatpush1.msra.mxu1 %v2932_v50  ;;  %v3869_v57 = vld [vmem:[#allocation10_spill] sm:$0xff]  ;;  %v3870_v50 = vld [vmem:[#allocation11_spill] sm:$0xff] }
 0x553   :  { %1694 = vmatprep.subr.mxu0 %v2939_v58  ;;  %1765 = vmatprep.subr.mxu1 %v2944_v49  ;;  %v3871_v58 = vld [vmem:[#allocation12_spill] sm:$0xff]  ;;  %v3872_v49 = vld [vmem:[#allocation13_spill] sm:$0xff] }
 0x554   :  { %1695 = vmatpush1.msra.mxu0 %v2951_v60  ;;  %1766 = vmatpush1.msra.mxu1 %v2956_v56  ;;  %v3873_v60 = vld [vmem:[#allocation14_spill] sm:$0xff]  ;;  %v3874_v56 = vld [vmem:[#allocation15_spill] sm:$0xff] }
 0x555   :  { %1696 = vmatprep.subr.mxu0 %v2963_v2  ;;  %1767 = vmatprep.subr.mxu1 %v2968_v4  ;;  %v3875_v2 = vld [vmem:[#allocation16_spill] sm:$0xff]  ;;  %v3876_v4 = vld [vmem:[#allocation17_spill] sm:$0xff] }
 0x556   :  { %1697 = vmatpush1.msra.mxu0 %v2975_v5  ;;  %1768 = vmatpush1.msra.mxu1 %v2980_v6  ;;  %v3877_v5 = vld [vmem:[#allocation18_spill] sm:$0xff]  ;;  %v3878_v6 = vld [vmem:[#allocation19_spill] sm:$0xff] }
 0x557   :  { %1698 = vmatprep.subr.mxu0 %v2987_v7  ;;  %1769 = vmatprep.subr.mxu1 %v2992_v8  ;;  %v3879_v7 = vld [vmem:[#allocation20_spill] sm:$0xff]  ;;  %v3880_v8 = vmov 0.0  }
 0x558   :  { %1699 = vmatpush1.msra.mxu0 %v2999_v9  ;;  %1770 = vmatpush1.msra.mxu1 %v3004_v10  ;;  %v3881_v9 = vld [vmem:[#allocation21_spill] sm:$0xff] }
 0x559   :  { %1700 = vmatprep.subr.mxu0 %v3011_v11  ;;  %1771 = vmatprep.subr.mxu1 %v3016_v12 }
 0x55a   :  { %1701 = vmatpush1.msra.mxu0 %v3023_v13  ;;  %1772 = vmatpush1.msra.mxu1 %v3028_v14 }
 0x55b   :  { %1702 = vmatprep.subr.mxu0 %v3035_v15  ;;  %1773 = vmatprep.subr.mxu1 %v3040_v16 }
 0x55c   :  { %1703 = vmatpush1.msra.mxu0 %v3047_v17  ;;  %1774 = vmatpush1.msra.mxu1 %v3052_v19  ;;  %v2186_v19 = vld [vmem:[%s3713_s0 + $0x28] sm:$0xff] }
 0x55d   :  { %1704 = vmatprep.subr.mxu0 %v3059_v20  ;;  %1775 = vmatprep.subr.mxu1 %v3064_v21 }
 0x55e   :  { %1705 = vmatpush1.msra.mxu0 %v3071_v22  ;;  %1776 = vmatpush1.msra.mxu1 %v3076_v23 }
 0x55f   :  { %1706 = vmatprep.subr.mxu0 %v3083_v24  ;;  %1777 = vmatprep.subr.mxu1 %v3088_v25 }
 0x560   :  { %1707 = vmatpush1.msra.mxu0 %v3095_v26  ;;  %1778 = vmatpush1.msra.mxu1 %v3100_v27 }
 0x561   :  { %1708 = vmatprep.subr.mxu0 %v3107_v28  ;;  %1779 = vmatprep.subr.mxu1 %v3112_v29 }
 0x562   :  { %1709 = vmatpush1.msra.mxu0 %v3119_v30  ;;  %1780 = vmatpush1.msra.mxu1 %v3124_v31 }
 0x563   :  { %1710 = vmatprep.subr.mxu0 %v3131_v32  ;;  %1781 = vmatprep.subr.mxu1 %v3136_v33 }
 0x564   :  { %1711 = vmatpush1.msra.mxu0 %v3143_v34  ;;  %1782 = vmatpush1.msra.mxu1 %v3148_v35 }
 0x565   :  { %1712 = vmatprep.subr.mxu0 %v3155_v36  ;;  %1783 = vmatprep.subr.mxu1 %v3160_v37  ;;  %v1613_v37 = vld [vmem:[#allocation3] sm:$0x3] }
 0x566   :  { %1713 = vmatpush1.msra.mxu0 %v3167_v38  ;;  %1784 = vmatpush1.msra.mxu1 %v3172_v39 }
 0x567   :  { %1714 = vmatprep.subr.mxu0 %v3865_v53  ;;  %1785 = vmatprep.subr.mxu1 %v3866_v0  ;;  %v1943_v53 = vld [vmem:[%s3712_s1 + $0x188] sm:$0xff]  ;;  %v1945_v0 = vld [vmem:[%s3712_s1 + $0x198] sm:$0xff] }
 0x568   :  { %1715 = vmatpush1.msra.mxu0 %v3867_v1  ;;  %1786 = vmatpush1.msra.mxu1 %v3868_v59  ;;  %v1942_v1 = vld [vmem:[%s3712_s1 + $0x180] sm:$0xff]  ;;  %v1944_v59 = vld [vmem:[%s3712_s1 + $0x190] sm:$0xff] }
 0x569   :  { %1716 = vmatprep.subr.mxu0 %v3869_v57  ;;  %1787 = vmatprep.subr.mxu1 %v3870_v50  ;;  %v1939_v57 = vld [vmem:[%s3712_s1 + $0x168] sm:$0xff]  ;;  %v1941_v50 = vld [vmem:[%s3712_s1 + $0x178] sm:$0xff] }
 0x56a   :  { %1717 = vmatpush1.msra.mxu0 %v3871_v58  ;;  %1788 = vmatpush1.msra.mxu1 %v3872_v49  ;;  %v1938_v58 = vld [vmem:[%s3712_s1 + $0x160] sm:$0xff]  ;;  %v1940_v49 = vld [vmem:[%s3712_s1 + $0x170] sm:$0xff] }
 0x56b   :  { %1718 = vmatprep.subr.mxu0 %v3873_v60  ;;  %1789 = vmatprep.subr.mxu1 %v3874_v56  ;;  %v1935_v60 = vld [vmem:[%s3712_s1 + $0x148] sm:$0xff]  ;;  %v1937_v56 = vld [vmem:[%s3712_s1 + $0x158] sm:$0xff] }
 0x56c   :  { %1719 = vmatpush1.msra.mxu0 %v3875_v2  ;;  %1790 = vmatpush1.msra.mxu1 %v3876_v4  ;;  %v1934_v2 = vld [vmem:[%s3712_s1 + $0x140] sm:$0xff]  ;;  %v1936_v4 = vld [vmem:[%s3712_s1 + $0x150] sm:$0xff] }
 0x56d   :  { %1720 = vmatprep.subr.mxu0 %v3877_v5  ;;  %1791 = vmatprep.subr.mxu1 %v3878_v6  ;;  %v1931_v5 = vld [vmem:[%s3712_s1 + $0x128] sm:$0xff]  ;;  %v1933_v6 = vld [vmem:[%s3712_s1 + $0x138] sm:$0xff] }
 0x56e   :  { %1721 = vmatpush1.msra.mxu0 %v3879_v7  ;;  %1754 = vmatprep.mubr.f32.mxu0 %v3880_v8  ;;  %v1930_v7 = vld [vmem:[%s3712_s1 + $0x120] sm:$0xff] }
 0x56f   :  { %1792 = vmatpush1.msra.mxu1 %v3881_v9  ;;  %1825 = vmatprep.mubr.f32.mxu1 %v3880_v8  ;;  %v1927_v9 = vld [vmem:[%s3712_s1 + $0x108] sm:$0xff] }
 0x570   :  { %1958 = vmatprep.subr.mxu0 %v1955_v51  ;;  %2029 = vmatprep.subr.mxu1 %v1957_v48  ;;  %v1896_v51 = vld [vmem:[%s3712_s1 + $0x10] sm:$0xff] }
 0x60f   :  { %v1488_v10 = vpop.f32.mrf.mxu0  ;;  %v1559_v11 = vpop.f32.mrf.mxu1 }
 0x611   :  { %v1490_v12 = vpop.f32.mrf.mxu0  ;;  %v1561_v13 = vpop.f32.mrf.mxu1 }
 0x612   :  { %v1568_v14 = vcombine.low %v1488_v10, %v1490_v12  ;;  %v1569_v15 = vcombine.low %v1559_v11, %v1561_v13  ;;  %v1929_v10 = vld [vmem:[%s3712_s1 + $0x118] sm:$0xff]  ;;  %v1926_v11 = vld [vmem:[%s3712_s1 + $0x100] sm:$0xff]  ;;  %v1928_v12 = vld [vmem:[%s3712_s1 + $0x110] sm:$0xff] }
 0x613   :  { %v1923_v13 = vld [vmem:[%s3712_s1 + $0xe8] sm:$0xff] }
 0x614   :  { %v1576_v16 = vrot.slane %v1568_v14, %v2804_v62  ;;  %v1583_v17 = vrot.slane %v1569_v15, %v2804_v62  ;;  %v1925_v14 = vld [vmem:[%s3712_s1 + $0xf8] sm:$0xff]  ;;  %v1922_v15 = vld [vmem:[%s3712_s1 + $0xe0] sm:$0xff] }
 0x616   :  { %v1584_v20 = vcombine.low %v1576_v16, %v1583_v17  ;;  %v1924_v16 = vld [vmem:[%s3712_s1 + $0xf0] sm:$0xff]  ;;  %v1919_v17 = vld [vmem:[%s3712_s1 + $0xc8] sm:$0xff] }
 0x618   :  { %v1586_v21 = vadd.f32 %v2186_v19, %v1584_v20  ;;  %v1921_v19 = vld [vmem:[%s3712_s1 + $0xd8] sm:$0xff]  ;;  %v1918_v20 = vld [vmem:[%s3712_s1 + $0xc0] sm:$0xff] }
 0x61a   :  { %v2187_v22 = vmul.f32 -1.442695, %v1586_v21  ;;  %v1594_v23 = vrot.slane %v1586_v21, 2  ;;  %v1605_v25 = vrot.slane %v1586_v21, 6  ;;  %v1602_v28 = vrot.slane %v1586_v21, 4  ;;  %v1920_v21 = vld [vmem:[%s3712_s1 + $0xd0] sm:$0xff] }
 0x61c   :  { %2283 = vpow2.f32 %v2187_v22  ;;  %v2188_v24 = vmul.f32 -1.442695, %v1594_v23  ;;  %v2189_v26 = vmul.f32 -1.442695, %v1605_v25  ;;  %v1915_v22 = vld [vmem:[%s3712_s1 + $0xa8] sm:$0xff]  ;;  %v1917_v23 = vld [vmem:[%s3712_s1 + $0xb8] sm:$0xff] }
 0x61d   :  { %v1916_v25 = vld [vmem:[%s3712_s1 + $0xb0] sm:$0xff] }
 0x61e   :  { %2285 = vpow2.f32 %v2188_v24  ;;  %v1914_v24 = vld [vmem:[%s3712_s1 + $0xa0] sm:$0xff] }
 0x61f   :  { %2287 = vpow2.f32 %v2189_v26  ;;  %v1911_v26 = vld [vmem:[%s3712_s1 + $0x88] sm:$0xff] }
 0x629   :  { %v2284_v27 = vpop.eup %2283 }
 0x62a   :  { %v1590_v29 = vadd.f32 1.0, %v2284_v27  ;;  %v1913_v27 = vld [vmem:[%s3712_s1 + $0x98] sm:$0xff] }
 0x62b   :  { %v2286_v30 = vpop.eup %2285 }
 0x62c   :  { %2289 = vrcp.f32 %v1590_v29  ;;  %v1599_v31 = vadd.f32 1.0, %v2286_v30  ;;  %v2288_v32 = vpop.eup %2287  ;;  %v1912_v29 = vld [vmem:[%s3712_s1 + $0x90] sm:$0xff]  ;;  %v1907_v30 = vld [vmem:[%s3712_s1 + $0x68] sm:$0xff] }
 0x62d   :  { %2291 = vtanh.f32 %v1602_v28  ;;  %v1610_v36 = vadd.f32 1.0, %v2288_v32  ;;  %v1910_v28 = vld [vmem:[%s3712_s1 + $0x80] sm:$0xff] }
 0x62e   :  { %2293 = vrcp.f32 %v1599_v31  ;;  %v1909_v31 = vld [vmem:[%s3712_s1 + $0x78] sm:$0xff]  ;;  %v1906_v32 = vld [vmem:[%s3712_s1 + $0x60] sm:$0xff] }
 0x62f   :  { %2295 = vrcp.f32 %v1610_v36  ;;  %v1902_v36 = vld [vmem:[%s3712_s1 + $0x40] sm:$0xff] }
 0x639   :  { %v2290_v33 = vpop.eup %2289 }
 0x63a   :  { %v2292_v34 = vpop.eup %2291 }
 0x63b   :  { %v2294_v35 = vpop.eup %2293  ;;  %v1615_v39 = vmul.f32 %v2292_v34, %v2290_v33  ;;  %v1908_v33 = vld [vmem:[%s3712_s1 + $0x70] sm:$0xff]  ;;  %v1903_v34 = vld [vmem:[%s3712_s1 + $0x48] sm:$0xff] }
 0x63c   :  { %v1614_v38 = vmul.f32 %v2294_v35, %v1613_v37  ;;  %v2296_v41 = vpop.eup %2295  ;;  %v1905_v35 = vld [vmem:[%s3712_s1 + $0x58] sm:$0xff]  ;;  %v1904_v37 = vld [vmem:[%s3712_s1 + $0x50] sm:$0xff] }
 0x63e   :  { %v1616_v42 = vadd.f32 %v1615_v39, %v1614_v38  ;;  %v1899_v38 = vld [vmem:[%s3712_s1 + $0x28] sm:$0xff]  ;;  %v1901_v39 = vld [vmem:[%s3712_s1 + $0x38] sm:$0xff] }
 0x640   :  { %2297 = vtanh.f32 %v1616_v42  ;;  %1619 = vst [vmem:[#allocation3] sm:$0x3] %v1616_v42  ;;  %v1898_v42 = vld [vmem:[%s3712_s1 + $0x20] sm:$0xff] }
 0x64d   :  { %v2298_v44 = vpop.eup %2297 }
 0x64e   :  { %v1618_v3 = vmul.f32 %v2298_v44, %v2296_v41  ;;  %v1900_v41 = vld [vmem:[%s3712_s1 + $0x30] sm:$0xff]  ;;  %v1895_v44 = vld [vmem:[%s3712_s1 + $0x8] sm:$0xff] }
 0x650   :  { %2190 = vst [vmem:[%s3714_s2 + $0xa] sm:$0x3] %v1618_v3  ;;  %1620 = vst [vmem:[#allocation2] sm:$0x3] %v1618_v3  ;;  %v1897_v3 = vld [vmem:[%s3712_s1 + $0x18] sm:$0xff] }
 0x657   :  { %v1625_v18 = vld [vmem:[#allocation2] sm:$0x3] }
 0x658   :  { %1755 = vmatmul.mubr.f32.vlgmr.msra.gmra.mxu0 %v1625_v18  ;;  %1826 = vmatmul.mubr.f32.vlgmr.msra.gmra.mxu1 %v1625_v18  ;;  %v1894_v18 = vld [vmem:[%s3712_s1] sm:$0xff] }
 0x659   :  { %2022 = vmatprep.mubr.f32.mxu0 %v3880_v8  ;;  %2093 = vmatprep.mubr.f32.mxu1 %v3880_v8  ;;  %v1932_v8 = vld [vmem:[%s3712_s1 + $0x130] sm:$0xff] }
 0x65a   :  { %1959 = vmatpush1.msra.mxu0 %v1954_v63  ;;  %2030 = vmatpush1.msra.mxu1 %v1956_v46 }
 0x65b   :  { %1960 = vmatprep.subr.mxu0 %v1951_v45  ;;  %2031 = vmatprep.subr.mxu1 %v1953_v54 }
 0x65c   :  { %1961 = vmatpush1.msra.mxu0 %v1950_v61  ;;  %2032 = vmatpush1.msra.mxu1 %v1952_v40 }
 0x65d   :  { %1962 = vmatprep.subr.mxu0 %v1947_v43  ;;  %2033 = vmatprep.subr.mxu1 %v1949_v55  ;;  %v2191_v55 = vld [vmem:[%s3713_s0 + $0x30] sm:$0xff] }
 0x65e   :  { %1963 = vmatpush1.msra.mxu0 %v1946_v47  ;;  %2034 = vmatpush1.msra.mxu1 %v1948_v52 }
 0x65f   :  { %1964 = vmatprep.subr.mxu0 %v1943_v53  ;;  %2035 = vmatprep.subr.mxu1 %v1945_v0 }
 0x660   :  { %1965 = vmatpush1.msra.mxu0 %v1942_v1  ;;  %2036 = vmatpush1.msra.mxu1 %v1944_v59 }
 0x661   :  { %1966 = vmatprep.subr.mxu0 %v1939_v57  ;;  %2037 = vmatprep.subr.mxu1 %v1941_v50 }
 0x662   :  { %1967 = vmatpush1.msra.mxu0 %v1938_v58  ;;  %2038 = vmatpush1.msra.mxu1 %v1940_v49 }
 0x663   :  { %1968 = vmatprep.subr.mxu0 %v1935_v60  ;;  %2039 = vmatprep.subr.mxu1 %v1937_v56 }
 0x664   :  { %1969 = vmatpush1.msra.mxu0 %v1934_v2  ;;  %2040 = vmatpush1.msra.mxu1 %v1936_v4 }
 0x665   :  { %1970 = vmatprep.subr.mxu0 %v1931_v5  ;;  %2041 = vmatprep.subr.mxu1 %v1933_v6 }
 0x666   :  { %1971 = vmatpush1.msra.mxu0 %v1930_v7  ;;  %2042 = vmatpush1.msra.mxu1 %v1932_v8  ;;  %v1881_v8 = vld [vmem:[#allocation3] sm:$0x3] }
 0x667   :  { %1972 = vmatprep.subr.mxu0 %v1927_v9  ;;  %2043 = vmatprep.subr.mxu1 %v1929_v10 }
 0x668   :  { %1973 = vmatpush1.msra.mxu0 %v1926_v11  ;;  %2044 = vmatpush1.msra.mxu1 %v1928_v12 }
 0x669   :  { %1974 = vmatprep.subr.mxu0 %v1923_v13  ;;  %2045 = vmatprep.subr.mxu1 %v1925_v14 }
 0x66a   :  { %1975 = vmatpush1.msra.mxu0 %v1922_v15  ;;  %2046 = vmatpush1.msra.mxu1 %v1924_v16 }
 0x66b   :  { %1976 = vmatprep.subr.mxu0 %v1919_v17  ;;  %2047 = vmatprep.subr.mxu1 %v1921_v19 }
 0x66c   :  { %1977 = vmatpush1.msra.mxu0 %v1918_v20  ;;  %2048 = vmatpush1.msra.mxu1 %v1920_v21 }
 0x66d   :  { %1978 = vmatprep.subr.mxu0 %v1915_v22  ;;  %2049 = vmatprep.subr.mxu1 %v1917_v23 }
 0x66e   :  { %1979 = vmatpush1.msra.mxu0 %v1914_v24  ;;  %2050 = vmatpush1.msra.mxu1 %v1916_v25  ;;  %v2196_v25 = vld [vmem:[%s3713_s0 + $0x38] sm:$0xff] }
 0x66f   :  { %1980 = vmatprep.subr.mxu0 %v1911_v26  ;;  %2051 = vmatprep.subr.mxu1 %v1913_v27 }
 0x670   :  { %1981 = vmatpush1.msra.mxu0 %v1910_v28  ;;  %2052 = vmatpush1.msra.mxu1 %v1912_v29 }
 0x671   :  { %1982 = vmatprep.subr.mxu0 %v1907_v30  ;;  %2053 = vmatprep.subr.mxu1 %v1909_v31 }
 0x672   :  { %1983 = vmatpush1.msra.mxu0 %v1906_v32  ;;  %2054 = vmatpush1.msra.mxu1 %v1908_v33 }
 0x673   :  { %1984 = vmatprep.subr.mxu0 %v1903_v34  ;;  %2055 = vmatprep.subr.mxu1 %v1905_v35 }
 0x674   :  { %1985 = vmatpush1.msra.mxu0 %v1902_v36  ;;  %2056 = vmatpush1.msra.mxu1 %v1904_v37 }
 0x675   :  { %1986 = vmatprep.subr.mxu0 %v1899_v38  ;;  %2057 = vmatprep.subr.mxu1 %v1901_v39 }
 0x676   :  { %1987 = vmatpush1.msra.mxu0 %v1898_v42  ;;  %2058 = vmatpush1.msra.mxu1 %v1900_v41 }
 0x677   :  { %1988 = vmatprep.subr.mxu0 %v1895_v44  ;;  %2059 = vmatprep.subr.mxu1 %v1897_v3 }
 0x678   :  { %1989 = vmatpush1.msra.mxu0 %v1894_v18  ;;  %2060 = vmatpush1.msra.mxu1 %v1896_v51 }
 0x718   :  { %v1756_v48 = vpop.f32.mrf.mxu0  ;;  %v1827_v63 = vpop.f32.mrf.mxu1 }
 0x71a   :  { %v1758_v46 = vpop.f32.mrf.mxu0  ;;  %v1829_v45 = vpop.f32.mrf.mxu1 }
 0x71b   :  { %v1836_v54 = vcombine.low %v1756_v48, %v1758_v46  ;;  %v1837_v61 = vcombine.low %v1827_v63, %v1829_v45 }
 0x71d   :  { %v1844_v40 = vrot.slane %v1836_v54, %v2804_v62  ;;  %v1851_v43 = vrot.slane %v1837_v61, %v2804_v62 }
 0x71f   :  { %v1852_v47 = vcombine.low %v1844_v40, %v1851_v43 }
 0x721   :  { %v1854_v52 = vadd.f32 %v2191_v55, %v1852_v47 }
 0x723   :  { %v2192_v53 = vmul.f32 -1.442695, %v1854_v52  ;;  %v1862_v0 = vrot.slane %v1854_v52, 2  ;;  %v1873_v59 = vrot.slane %v1854_v52, 6  ;;  %v1870_v58 = vrot.slane %v1854_v52, 4 }
 0x725   :  { %2299 = vpow2.f32 %v2192_v53  ;;  %v2193_v1 = vmul.f32 -1.442695, %v1862_v0  ;;  %v2194_v57 = vmul.f32 -1.442695, %v1873_v59 }
 0x727   :  { %2301 = vpow2.f32 %v2193_v1 }
 0x728   :  { %2303 = vpow2.f32 %v2194_v57 }
 0x732   :  { %v2300_v50 = vpop.eup %2299 }
 0x733   :  { %v1858_v49 = vadd.f32 1.0, %v2300_v50 }
 0x734   :  { %v2302_v60 = vpop.eup %2301 }
 0x735   :  { %2305 = vrcp.f32 %v1858_v49  ;;  %v1867_v56 = vadd.f32 1.0, %v2302_v60  ;;  %v2304_v2 = vpop.eup %2303 }
 0x736   :  { %2307 = vtanh.f32 %v1870_v58  ;;  %v1878_v7 = vadd.f32 1.0, %v2304_v2 }
 0x737   :  { %2309 = vrcp.f32 %v1867_v56 }
 0x738   :  { %2311 = vrcp.f32 %v1878_v7 }
 0x742   :  { %v2306_v4 = vpop.eup %2305 }
 0x743   :  { %v2308_v5 = vpop.eup %2307 }
 0x744   :  { %v2310_v6 = vpop.eup %2309  ;;  %v1883_v10 = vmul.f32 %v2308_v5, %v2306_v4 }
 0x745   :  { %v1882_v9 = vmul.f32 %v2310_v6, %v1881_v8  ;;  %v2312_v12 = vpop.eup %2311 }
 0x747   :  { %v1884_v11 = vadd.f32 %v1883_v10, %v1882_v9 }
 0x749   :  { %2313 = vtanh.f32 %v1884_v11  ;;  %1887 = vst [vmem:[#allocation3] sm:$0x3] %v1884_v11 }
 0x750   :  { %v2149_v44 = vld [vmem:[#allocation3] sm:$0x3] }
 0x756   :  { %v2314_v13 = vpop.eup %2313 }
 0x757   :  { %v1886_v14 = vmul.f32 %v2314_v13, %v2312_v12 }
 0x759   :  { %2195 = vst [vmem:[%s3714_s2 + $0xc] sm:$0x3] %v1886_v14  ;;  %1888 = vst [vmem:[#allocation2] sm:$0x3] %v1886_v14 }
 0x760   :  { %v1893_v15 = vld [vmem:[#allocation2] sm:$0x3] }
 0x761   :  { %2023 = vmatmul.mubr.f32.vlgmr.msra.gmra.mxu0 %v1893_v15  ;;  %2094 = vmatmul.mubr.f32.vlgmr.msra.gmra.mxu1 %v1893_v15 }
 0x821   :  { %v2024_v16 = vpop.f32.mrf.mxu0  ;;  %v2095_v17 = vpop.f32.mrf.mxu1 }
 0x823   :  { %v2026_v19 = vpop.f32.mrf.mxu0  ;;  %v2097_v20 = vpop.f32.mrf.mxu1 }
 0x824   :  { %v2104_v21 = vcombine.low %v2024_v16, %v2026_v19  ;;  %v2105_v22 = vcombine.low %v2095_v17, %v2097_v20 }
 0x826   :  { %v2112_v23 = vrot.slane %v2104_v21, %v2804_v62  ;;  %v2119_v24 = vrot.slane %v2105_v22, %v2804_v62 }
 0x828   :  { %v2120_v26 = vcombine.low %v2112_v23, %v2119_v24 }
 0x82a   :  { %v2122_v27 = vadd.f32 %v2196_v25, %v2120_v26 }
 0x82c   :  { %v2197_v28 = vmul.f32 -1.442695, %v2122_v27  ;;  %v2130_v29 = vrot.slane %v2122_v27, 2  ;;  %v2141_v31 = vrot.slane %v2122_v27, 6  ;;  %v2138_v34 = vrot.slane %v2122_v27, 4 }
 0x82e   :  { %2315 = vpow2.f32 %v2197_v28  ;;  %v2198_v30 = vmul.f32 -1.442695, %v2130_v29  ;;  %v2199_v32 = vmul.f32 -1.442695, %v2141_v31 }
 0x830   :  { %2317 = vpow2.f32 %v2198_v30 }
 0x831   :  { %2319 = vpow2.f32 %v2199_v32 }
 0x83b   :  { %v2316_v33 = vpop.eup %2315 }
 0x83c   :  { %v2126_v35 = vadd.f32 1.0, %v2316_v33 }
 0x83d   :  { %v2318_v36 = vpop.eup %2317 }
 0x83e   :  { %2321 = vrcp.f32 %v2126_v35  ;;  %v2135_v62 = vadd.f32 1.0, %v2318_v36  ;;  %v2320_v37 = vpop.eup %2319 }
 0x83f   :  { %2323 = vtanh.f32 %v2138_v34  ;;  %v2146_v41 = vadd.f32 1.0, %v2320_v37 }
 0x840   :  { %2325 = vrcp.f32 %v2135_v62 }
 0x841   :  { %2327 = vrcp.f32 %v2146_v41 }
 0x84b   :  { %v2322_v38 = vpop.eup %2321 }
 0x84c   :  { %v2324_v39 = vpop.eup %2323 }
 0x84d   :  { %v2326_v42 = vpop.eup %2325  ;;  %v2151_v18 = vmul.f32 %v2324_v39, %v2322_v38 }
 0x84e   :  { %v2150_v3 = vmul.f32 %v2326_v42, %v2149_v44  ;;  %v2328_v48 = vpop.eup %2327 }
 0x850   :  { %v2152_v51 = vadd.f32 %v2151_v18, %v2150_v3 }
 0x852   :  { %2329 = vtanh.f32 %v2152_v51  ;;  %2155 = vst [vmem:[#allocation3] sm:$0x3] %v2152_v51 }
 0x85f   :  { %v2330_v63 = vpop.eup %2329 }
 0x860   :  { %v2154_v46 = vmul.f32 %v2330_v63, %v2328_v48 }
 0x862   :  { %2156 = vst [vmem:[#allocation2] sm:$0x3] %v2154_v46  ;;  %2200 = vst [vmem:[%s3714_s2 + $0xe] sm:$0x3] %v2154_v46 }

</bundles_post_ra>
